<compile_context>
chip_gen: v6e
topology: v6e:2x2x1
jax: 0.10.0
libtpu: 0.0.40
codegen_flags: <defaults>
</compile_context>

<pallas_src>
import jax
import jax.numpy as jnp
from jax.experimental import pallas as pl
from jax.experimental.pallas import tpu as pltpu


def _fcnet_kernel(x_ref, w1_ref, b1_ref, w2_ref, b2_ref, o_ref):
    # fc1: bf16 x bf16 -> f32 accumulation on the MXU, then bias + ReLU (VPU).
    h = jnp.dot(x_ref[...], w1_ref[...], preferred_element_type=jnp.float32)
    h = jnp.maximum(h + b1_ref[...], 0.0)
    # fc2 has a single output column: a full MXU pass would use 1 lane, so do
    # it as a VPU multiply + cross-lane (XLU) reduction instead.
    z = jnp.sum(h * w2_ref[...], axis=-1, keepdims=True) + b2_ref[0, 0]
    # Sigmoid: exp and approximate reciprocal both land on the EUP slot.
    o_ref[...] = pl.reciprocal(1.0 + jnp.exp(-z), approx=True).astype(o_ref.dtype)


def _round_up(x, m):
    return ((x + m - 1) // m) * m


def simple_fc_net(x, w1, b1, w2, b2, *, block_m=256):
    """Forward pass of SimpleFCNet.

    x : (B, ...)  -- flattened to (B, D) like x.view(B, -1)
    w1: (D, H) = fc1.weight.T   b1: (1, H)
    w2: (H, 1) = fc2.weight.T   b2: (1, 1)
    Returns (B, 1) float32 probabilities.
    """
    B = x.shape[0]
    x2d = x.reshape(B, -1)
    D = x2d.shape[1]
    H = w1.shape[1]
    assert w1.shape == (D, H) and b1.shape == (1, H)
    assert w2.shape == (H, 1) and b2.shape == (1, 1)

    # MXU-friendly row tile; don't over-pad tiny batches, and allow any B by
    # padding the batch up to a multiple of the tile (sliced off afterwards).
    block_m = max(128, min(block_m, _round_up(B, 128)))
    b_pad = _round_up(B, block_m)

    # bf16 operands for the MXU: halves HBM traffic for x and w1; the matmul
    # still accumulates in f32.
    x_bf16 = x2d.astype(jnp.bfloat16)
    if b_pad != B:
        x_bf16 = jnp.pad(x_bf16, ((0, b_pad - B), (0, 0)))
    w1_bf16 = w1.astype(jnp.bfloat16)
    w2_row = w2.reshape(1, H).astype(jnp.float32)   # (H,1) -> lane-dense (1,H)
    b1_f32 = b1.astype(jnp.float32)
    b2_f32 = b2.astype(jnp.float32)

    grid = (b_pad // block_m,)
    out = pl.pallas_call(
        _fcnet_kernel,
        out_shape=jax.ShapeDtypeStruct((b_pad, 1), jnp.float32),
        grid_spec=pltpu.PrefetchScalarGridSpec(
            num_scalar_prefetch=0,
            grid=grid,
            in_specs=[
                # streaming activation tile (double-buffered by default)
                pl.BlockSpec((block_m, D), lambda i: (i, 0)),
                # grid-invariant weights/biases: fetch once, single-buffer
                pl.BlockSpec((D, H), lambda i: (0, 0),
                             pipeline_mode=pl.Buffered(1)),
                pl.BlockSpec((1, H), lambda i: (0, 0),
                             pipeline_mode=pl.Buffered(1)),
                pl.BlockSpec((1, H), lambda i: (0, 0),
                             pipeline_mode=pl.Buffered(1)),
                # scalar bias in SMEM (avoids a padded (8,128) VMEM tile + DMA)
                pl.BlockSpec(memory_space=pltpu.MemorySpace.SMEM),
            ],
            out_specs=pl.BlockSpec((block_m, 1), lambda i: (i, 0)),
        ),
        compiler_params=pltpu.CompilerParams(
            dimension_semantics=("parallel",),
            vmem_limit_bytes=48 * 1024 * 1024,
        ),
    )(x_bf16, w1_bf16, b1_f32, w2_row, b2_f32)
    return out[:B]


def init_params(key, input_dim, hidden=512):
    """Deterministic init mimicking nn.Linear's uniform(-1/sqrt(fan_in), +)."""
    k1, k2, k3, k4 = jax.random.split(key, 4)
    lim1 = 1.0 / jnp.sqrt(jnp.float32(input_dim))
    lim2 = 1.0 / jnp.sqrt(jnp.float32(hidden))
    w1 = jax.random.uniform(k1, (input_dim, hidden), jnp.float32, -lim1, lim1)
    b1 = jax.random.uniform(k2, (1, hidden), jnp.float32, -lim1, lim1)
    w2 = jax.random.uniform(k3, (hidden, 1), jnp.float32, -lim2, lim2)
    b2 = jax.random.uniform(k4, (1, 1), jnp.float32, -lim2, lim2)
    return w1, b1, w2, b2


if __name__ == "__main__":
    # Small shapes consistent with the module (flatten -> D=1024, hidden=512).
    B, C, Hs, Ws = 8, 4, 16, 16
    D = C * Hs * Ws                  # 1024
    HIDDEN = 512

    key = jax.random.PRNGKey(0)
    kx, kp = jax.random.split(key)
    x = jax.random.normal(kx, (B, C, Hs, Ws), jnp.float32)
    w1, b1, w2, b2 = init_params(kp, D, HIDDEN)

    out = simple_fc_net(x, w1, b1, w2, b2)
    out = jax.block_until_ready(out)

    # Pure-JAX f32 reference. Kernel uses bf16 matmul inputs + approx
    # reciprocal, so use a correspondingly loose (but meaningful) tolerance.
    x2d = x.reshape(B, -1)
    ref = jax.nn.sigmoid(jnp.maximum(x2d @ w1 + b1, 0.0) @ w2 + b2)
    assert out.shape == (B, 1)
    max_err = float(jnp.max(jnp.abs(out - ref)))
    assert jnp.allclose(out, ref, atol=2e-2, rtol=0.0), max_err

    print("KERNEL_OK")
</pallas_src>

<mosaic_0001>
module attributes {stable_mosaic.version = 11 : i64} {
  func.func @_fcnet_kernel(%arg0: i32, %arg1: memref<128x1024xbf16, #tpu.memory_space<vmem>>, %arg2: memref<1024x512xbf16, #tpu.memory_space<vmem>>, %arg3: memref<1x512xf32, #tpu.memory_space<vmem>>, %arg4: memref<1x512xf32, #tpu.memory_space<vmem>>, %arg5: memref<1x1xf32, #tpu.memory_space<smem>>, %arg6: memref<128x1xf32, #tpu.memory_space<vmem>>) attributes {dimension_semantics = [#tpu.dimension_semantics<parallel>], iteration_bounds = array<i64: 1>, scalar_prefetch = 0 : i64, scratch_operands = 0 : i64, tpu.core_type = #tpu.core_type<tc>, window_params = [{transform_indices = @transform_0, window_bounds = array<i64: 128, 1024>}, {pipeline_mode = #tpu.pipeline_mode<synchronous>, transform_indices = @transform_1, window_bounds = array<i64: 1024, 512>}, {pipeline_mode = #tpu.pipeline_mode<synchronous>, transform_indices = @transform_2, window_bounds = array<i64: 1, 512>}, {pipeline_mode = #tpu.pipeline_mode<synchronous>, transform_indices = @transform_3, window_bounds = array<i64: 1, 512>}, {transform_indices = @transform_4, window_bounds = array<i64: 1, 1>}, {transform_indices = @transform_5, window_bounds = array<i64: 128, 1>}]} {
    %c0 = arith.constant 0 : index
    %c0_0 = arith.constant 0 : index
    %0 = vector.load %arg1[%c0, %c0_0] : memref<128x1024xbf16, #tpu.memory_space<vmem>>, vector<128x1024xbf16>
    %c0_1 = arith.constant 0 : index
    %c0_2 = arith.constant 0 : index
    %1 = vector.load %arg2[%c0_1, %c0_2] : memref<1024x512xbf16, #tpu.memory_space<vmem>>, vector<1024x512xbf16>
    %cst = arith.constant dense<0.000000e+00> : vector<128x512xf32>
    %2 = tpu.matmul %0, %1, %cst {dimension_numbers = #tpu.dot_dimension_numbers<[1], [0], [0], [1], [0, 0, 1, 1], [], []>} : vector<128x1024xbf16>, vector<1024x512xbf16>, vector<128x512xf32> -> vector<128x512xf32>
    %c0_3 = arith.constant 0 : index
    %c0_4 = arith.constant 0 : index
    %3 = vector.load %arg3[%c0_3, %c0_4] : memref<1x512xf32, #tpu.memory_space<vmem>>, vector<1x512xf32>
    %4 = vector.broadcast %3 : vector<1x512xf32> to vector<128x512xf32>
    %5 = arith.addf %2, %4 : vector<128x512xf32>
    %cst_5 = arith.constant 0.000000e+00 : f32
    %6 = vector.broadcast %cst_5 : f32 to vector<128x512xf32>
    %7 = arith.maximumf %5, %6 : vector<128x512xf32>
    %c0_6 = arith.constant 0 : index
    %c0_7 = arith.constant 0 : index
    %8 = vector.load %arg4[%c0_6, %c0_7] : memref<1x512xf32, #tpu.memory_space<vmem>>, vector<1x512xf32>
    %9 = vector.broadcast %8 : vector<1x512xf32> to vector<128x512xf32>
    %10 = arith.mulf %7, %9 : vector<128x512xf32>
    %cst_8 = arith.constant dense<0.000000e+00> : vector<128xf32>
    %11 = vector.multi_reduction <add>, %10, %cst_8 [1] : vector<128x512xf32> to vector<128xf32>
    %12 = vector.shape_cast %11 : vector<128xf32> to vector<128x1xf32>
    %c0_9 = arith.constant 0 : index
    %c0_10 = arith.constant 0 : index
    %13 = memref.load %arg5[%c0_9, %c0_10] : memref<1x1xf32, #tpu.memory_space<smem>>
    %14 = vector.broadcast %13 : f32 to vector<128x1xf32>
    %15 = arith.addf %12, %14 : vector<128x1xf32>
    %cst_11 = arith.constant 0.000000e+00 : f32
    %16 = vector.broadcast %cst_11 : f32 to vector<128x1xf32>
    %17 = arith.subf %16, %15 : vector<128x1xf32>
    %18 = math.exp %17 : vector<128x1xf32>
    %cst_12 = arith.constant 1.000000e+00 : f32
    %19 = vector.broadcast %cst_12 : f32 to vector<128x1xf32>
    %20 = arith.addf %19, %18 : vector<128x1xf32>
    %21 = tpu.reciprocal %20 {approx = true} : vector<128x1xf32> -> vector<128x1xf32>
    %c0_13 = arith.constant 0 : index
    %c0_14 = arith.constant 0 : index
    %22 = vector.load %arg6[%c0_13, %c0_14] : memref<128x1xf32, #tpu.memory_space<vmem>>, vector<128x1xf32>
    tpu.vector_store %arg6[%c0_13, %c0_14], %21 {strides = array<i32>} : memref<128x1xf32, #tpu.memory_space<vmem>>, vector<128x1xf32>,
    return
  }
  func.func @transform_0(%arg0: i32) -> (i32, i32) {
    %c0_i32 = arith.constant 0 : i32
    %c0_i32_0 = arith.constant 0 : i32
    return %arg0, %c0_i32 : i32, i32
  }
  func.func @transform_1(%arg0: i32) -> (i32, i32) {
    %c0_i32 = arith.constant 0 : i32
    %c0_i32_0 = arith.constant 0 : i32
    %c0_i32_1 = arith.constant 0 : i32
    return %c0_i32, %c0_i32_0 : i32, i32
  }
  func.func @transform_2(%arg0: i32) -> (i32, i32) {
    %c0_i32 = arith.constant 0 : i32
    %c0_i32_0 = arith.constant 0 : i32
    %c0_i32_1 = arith.constant 0 : i32
    return %c0_i32, %c0_i32_0 : i32, i32
  }
  func.func @transform_3(%arg0: i32) -> (i32, i32) {
    %c0_i32 = arith.constant 0 : i32
    %c0_i32_0 = arith.constant 0 : i32
    %c0_i32_1 = arith.constant 0 : i32
    return %c0_i32, %c0_i32_0 : i32, i32
  }
  func.func @transform_4(%arg0: i32) -> (i32, i32) {
    %c0_i32 = arith.constant 0 : i32
    %c0_i32_0 = arith.constant 0 : i32
    %c0_i32_1 = arith.constant 0 : i32
    return %c0_i32, %c0_i32_0 : i32, i32
  }
  func.func @transform_5(%arg0: i32) -> (i32, i32) {
    %c0_i32 = arith.constant 0 : i32
    %c0_i32_0 = arith.constant 0 : i32
    return %arg0, %c0_i32 : i32, i32
  }
}

</mosaic_0001>

<bundles_post_ra>
// kernel: tpu_custom_call.1
= control target key start
LH: loop header
LB: loop body
LE: loop exit
PB: predicated region body
PF: predicated region fallthrough
CT: control target
= control target key end

     0   :  { %11 = vsyncpa [#allocation4], 0  ;;  %s4992_s0 = inlined_call_operand.hbm [shape: bf16[128,1024], index: 0, kind: input, shape index: {}]   ;;  %s4993_s1 = inlined_call_operand.hbm [shape: bf16[1024,512], index: 1, kind: input, shape index: {}]   ;;  %s4994_s2 = inlined_call_operand.vmem [shape: f32[1,512], index: 2, kind: input, shape index: {}]   ;;  %s4995_s3 = inlined_call_operand.hbm [shape: f32[1,512], index: 3, kind: input, shape index: {}]   ;;  %s4996_s4 = inlined_call_operand.<no memory space> [shape: f32[1,1], index: 4, kind: input, shape index: {}]   ;;  %s4997_s5 = inlined_call_operand.vmem [shape: f32[128,1], index: 5, kind: output, shape index: {}]  }
   0x1   :  { %12 = vsyncpa [#allocation6], 0  ;;  %s4096_s18 = smov [#allocation5]  }
   0x2   :  { %s30_s19 = sshll.u32 %s4096_s18, 4  ;;  %s31_s19 = int_to_ptr.vmem [resolvable:$true] %s30_s19 }
   0x3   :  { %s4040_s20 = scalar_lea.vmem %s31_s19, 32768  ;;  %p4045_p1 = scmp.lt.s32.totalorder %s31_s19, %s31_s19 }
   0x4   :  { %p4041_p0 = scmp.ne.s32.totalorder %s31_s19, %s4040_s20  ;;  %p4046_p2 = scmp.lt.s32.totalorder %s4040_s20, %s4040_s20 }
   0x6   :  { %p4047_p3 = por %p4046_p2, %p4045_p1 }
   0x8   :  { %p4048_p4 = pnand %p4047_p3, %p4041_p0 }
   0xa   :  { %4051 = shalt.err (!%p4048_p4)
}
   0xb   :  { %s4097_s21 = smov 256   ;;  %s4098_s22 = smov 16  }
   0xc   :  { %36 = dma.hbm_to_vmem [thread:$0]  %s4993_s1, 32768, %s31_s19, [#allocation6], %s4097_s21, %s4097_s21, %s4098_s22  }
   0xd   :  { %s4099_s25 = smov [#allocation3]  }
   0xe   :  { %s18_s26 = sshll.u32 %s4099_s25, 4  ;;  %s19_s26 = int_to_ptr.vmem [resolvable:$true] %s18_s26 }
   0xf   :  { %s4060_s27 = scalar_lea.vmem %s19_s26, 8192  ;;  %p4065_p6 = scmp.lt.s32.totalorder %s19_s26, %s19_s26 }
  0x10   :  { %p4061_p5 = scmp.ne.s32.totalorder %s19_s26, %s4060_s27  ;;  %p4066_p7 = scmp.lt.s32.totalorder %s4060_s27, %s4060_s27 }
  0x12   :  { %p4067_p8 = por %p4066_p7, %p4065_p6 }
  0x14   :  { %p4068_p9 = pnand %p4067_p8, %p4061_p5 }
  0x16   :  { %4071 = shalt.err (!%p4068_p9)
}
  0x17   :  { %s4100_s28 = smov 512   ;;  %s4101_s29 = smov 32  }
  0x18   :  { %24 = dma.hbm_to_vmem [thread:$0]  %s4992_s0, 8192, %s19_s26, [#allocation4], %s4100_s28, %s4100_s28, %s4101_s29  }
  0x19   :  { %s4102_s7 = smov [#allocation7]  }
  0x1a   :  { %s45_s8 = sshll.u32 %s4102_s7, 4  ;;  %s46_s8 = int_to_ptr.vmem [resolvable:$true] %s45_s8 }
  0x1b   :  { %s4080_s1 = scalar_lea.vmem %s46_s8, 64  ;;  %p4085_p11 = scmp.lt.s32.totalorder %s46_s8, %s46_s8 }
  0x1c   :  { %p4081_p10 = scmp.ne.s32.totalorder %s46_s8, %s4080_s1  ;;  %p4086_p12 = scmp.lt.s32.totalorder %s4080_s1, %s4080_s1 }
  0x1e   :  { %p4087_p13 = por %p4086_p12, %p4085_p11 }
  0x20   :  { %p4088_p0 = pnand %p4087_p13, %p4081_p10 }
  0x22   :  { %4091 = shalt.err (!%p4088_p0)
}
  0x23   :  { %48 = dma.hbm_to_vmem [thread:$0]  %s4995_s3, 64, %s46_s8, [#allocation6]  }
  0x24   :  { %4092 = dma.done.wait [#allocation4], 8192  }
  0x25   :  { %4093 = vsyncadd [#allocation4], 4294959104 }
  0x26   :  { %4094 = dma.done.wait [#allocation6], 32832  }
  0x27   :  { %4095 = vsyncadd [#allocation6], 4294934464  ;;  %v3584_v0 = vld [vmem:[#allocation5 + $0xe4] ss:$16 sps:$4 sm:$0xff]   ;;  %v3588_v2 = vld [vmem:[#allocation5 + $0xe0] ss:$16 sps:$4 sm:$0xff]  }
  0x28   :  { %v3586_v1 = vld [vmem:[#allocation5 + $0x2e4] ss:$16 sps:$4 sm:$0xff]   ;;  %2002 = vmatprep.subr.bf16.mxu0 %v3584_v0  ;;  %v3589_v3 = vld [vmem:[#allocation5 + $0x2e0] ss:$16 sps:$4 sm:$0xff]   ;;  %v61_v50 = vld [vmem:[#allocation3 + $0x8] sm:$0xff]  ;;  %vm3234_vm0 = vcmask 7168  }
  0x29   :  { %2115 = vmatprep.subr.bf16.mxu1 %v3586_v1  ;;  %v3590_v4 = vld [vmem:[#allocation5 + $0xc4] ss:$16 sps:$4 sm:$0xff]   ;;  %2003 = vmatpush1.bf16.msra.mxu0 %v3588_v2  ;;  %v3594_v6 = vld [vmem:[#allocation5 + $0xc0] ss:$16 sps:$4 sm:$0xff]   ;;  %v65_v51 = vld [vmem:[#allocation3 + $0x28] sm:$0xff] }
  0x2a   :  { %2116 = vmatpush1.bf16.msra.mxu1 %v3589_v3  ;;  %v3592_v5 = vld [vmem:[#allocation5 + $0x2c4] ss:$16 sps:$4 sm:$0xff]   ;;  %2004 = vmatprep.subr.bf16.mxu0 %v3590_v4  ;;  %v3595_v7 = vld [vmem:[#allocation5 + $0x2c0] ss:$16 sps:$4 sm:$0xff]   ;;  %v4144_v55 = vcombine.high %v61_v50, %v65_v51 }
  0x2b   :  { %2117 = vmatprep.subr.bf16.mxu1 %v3592_v5  ;;  %v3596_v8 = vld [vmem:[#allocation5 + $0xa4] ss:$16 sps:$4 sm:$0xff]   ;;  %v3600_v10 = vld [vmem:[#allocation5 + $0xa0] ss:$16 sps:$4 sm:$0xff]  }
  0x2c   :  { %v3598_v9 = vld [vmem:[#allocation5 + $0x2a4] ss:$16 sps:$4 sm:$0xff]   ;;  %v3601_v11 = vld [vmem:[#allocation5 + $0x2a0] ss:$16 sps:$4 sm:$0xff]   ;;  %2147 = vmatprep.mubr.bf16.mxu1 %v4144_v55 }
  0x2d   :  { %2005 = vmatpush1.bf16.msra.mxu0 %v3594_v6  ;;  %v3602_v12 = vld [vmem:[#allocation5 + $0x84] ss:$16 sps:$4 sm:$0xff]   ;;  %v3606_v14 = vld [vmem:[#allocation5 + $0x80] ss:$16 sps:$4 sm:$0xff]  }
  0x2e   :  { %2118 = vmatpush1.bf16.msra.mxu1 %v3595_v7  ;;  %2006 = vmatprep.subr.bf16.mxu0 %v3596_v8  ;;  %v3604_v13 = vld [vmem:[#allocation5 + $0x284] ss:$16 sps:$4 sm:$0xff]   ;;  %v3607_v15 = vld [vmem:[#allocation5 + $0x280] ss:$16 sps:$4 sm:$0xff]  }
  0x2f   :  { %2119 = vmatprep.subr.bf16.mxu1 %v3598_v9  ;;  %v3608_v16 = vld [vmem:[#allocation5 + $0x64] ss:$16 sps:$4 sm:$0xff]   ;;  %v3612_v18 = vld [vmem:[#allocation5 + $0x60] ss:$16 sps:$4 sm:$0xff]  }
  0x30   :  { %v3610_v17 = vld [vmem:[#allocation5 + $0x264] ss:$16 sps:$4 sm:$0xff]   ;;  %v3613_v19 = vld [vmem:[#allocation5 + $0x260] ss:$16 sps:$4 sm:$0xff]  }
  0x31   :  { %2007 = vmatpush1.bf16.msra.mxu0 %v3600_v10  ;;  %v3614_v20 = vld [vmem:[#allocation5 + $0x44] ss:$16 sps:$4 sm:$0xff]   ;;  %v3618_v22 = vld [vmem:[#allocation5 + $0x40] ss:$16 sps:$4 sm:$0xff]  }
  0x32   :  { %2120 = vmatpush1.bf16.msra.mxu1 %v3601_v11  ;;  %2008 = vmatprep.subr.bf16.mxu0 %v3602_v12  ;;  %v3616_v21 = vld [vmem:[#allocation5 + $0x244] ss:$16 sps:$4 sm:$0xff]   ;;  %v3619_v23 = vld [vmem:[#allocation5 + $0x240] ss:$16 sps:$4 sm:$0xff]   ;;  %v4150_v12 = vcombine.low %v61_v50, %v65_v51 }
  0x33   :  { %2121 = vmatprep.subr.bf16.mxu1 %v3604_v13  ;;  %v3620_v24 = vld [vmem:[#allocation5 + $0x24] ss:$16 sps:$4 sm:$0xff]   ;;  %v3624_v26 = vld [vmem:[#allocation5 + $0x20] ss:$16 sps:$4 sm:$0xff]  }
  0x34   :  { %v3622_v25 = vld [vmem:[#allocation5 + $0x224] ss:$16 sps:$4 sm:$0xff]   ;;  %v3625_v27 = vld [vmem:[#allocation5 + $0x220] ss:$16 sps:$4 sm:$0xff]  }
  0x35   :  { %2009 = vmatpush1.bf16.msra.mxu0 %v3606_v14  ;;  %v3626_v28 = vld [vmem:[#allocation5 + $0x4] ss:$16 sps:$4 sm:$0xff]   ;;  %v3630_v30 = vld [vmem:[#allocation5] ss:$16 sps:$4 sm:$0xff]   ;;  %v69_v14 = vld [vmem:[#allocation3 + $0x48] sm:$0xff] }
  0x36   :  { %2122 = vmatpush1.bf16.msra.mxu1 %v3607_v15  ;;  %2010 = vmatprep.subr.bf16.mxu0 %v3608_v16  ;;  %v3628_v29 = vld [vmem:[#allocation5 + $0x204] ss:$16 sps:$4 sm:$0xff]   ;;  %v3631_v31 = vld [vmem:[#allocation5 + $0x200] ss:$16 sps:$4 sm:$0xff]   ;;  %v73_v15 = vld [vmem:[#allocation3 + $0x68] sm:$0xff] }
  0x37   :  { %2123 = vmatprep.subr.bf16.mxu1 %v3610_v17  ;;  %v3632_v32 = vld [vmem:[#allocation5 + $0x1e4] ss:$16 sps:$4 sm:$0xff]   ;;  %v3636_v34 = vld [vmem:[#allocation5 + $0x1e0] ss:$16 sps:$4 sm:$0xff]  }
  0x38   :  { %v3634_v33 = vld [vmem:[#allocation5 + $0x3e4] ss:$16 sps:$4 sm:$0xff]   ;;  %v3637_v35 = vld [vmem:[#allocation5 + $0x3e0] ss:$16 sps:$4 sm:$0xff]  }
  0x39   :  { %2011 = vmatpush1.bf16.msra.mxu0 %v3612_v18  ;;  %v3638_v36 = vld [vmem:[#allocation5 + $0x1c4] ss:$16 sps:$4 sm:$0xff]   ;;  %v3642_v38 = vld [vmem:[#allocation5 + $0x1c0] ss:$16 sps:$4 sm:$0xff]  }
  0x3a   :  { %2124 = vmatpush1.bf16.msra.mxu1 %v3613_v19  ;;  %2012 = vmatprep.subr.bf16.mxu0 %v3614_v20  ;;  %v3640_v37 = vld [vmem:[#allocation5 + $0x3c4] ss:$16 sps:$4 sm:$0xff]   ;;  %v3643_v39 = vld [vmem:[#allocation5 + $0x3c0] ss:$16 sps:$4 sm:$0xff]   ;;  %v4154_v19 = vcombine.high %v69_v14, %v73_v15 }
  0x3b   :  { %2125 = vmatprep.subr.bf16.mxu1 %v3616_v21  ;;  %v3644_v40 = vld [vmem:[#allocation5 + $0x1a4] ss:$16 sps:$4 sm:$0xff]   ;;  %v3648_v42 = vld [vmem:[#allocation5 + $0x1a0] ss:$16 sps:$4 sm:$0xff]  }
  0x3c   :  { %v3646_v41 = vld [vmem:[#allocation5 + $0x3a4] ss:$16 sps:$4 sm:$0xff]   ;;  %v3649_v43 = vld [vmem:[#allocation5 + $0x3a0] ss:$16 sps:$4 sm:$0xff]  }
  0x3d   :  { %2013 = vmatpush1.bf16.msra.mxu0 %v3618_v22  ;;  %v3650_v44 = vld [vmem:[#allocation5 + $0x184] ss:$16 sps:$4 sm:$0xff]   ;;  %v3654_v46 = vld [vmem:[#allocation5 + $0x180] ss:$16 sps:$4 sm:$0xff]  }
  0x3e   :  { %2126 = vmatpush1.bf16.msra.mxu1 %v3619_v23  ;;  %2014 = vmatprep.subr.bf16.mxu0 %v3620_v24  ;;  %v3652_v45 = vld [vmem:[#allocation5 + $0x384] ss:$16 sps:$4 sm:$0xff]   ;;  %v3655_v47 = vld [vmem:[#allocation5 + $0x380] ss:$16 sps:$4 sm:$0xff]  }
  0x3f   :  { %2127 = vmatprep.subr.bf16.mxu1 %v3622_v25  ;;  %v60_v48 = vld [vmem:[#allocation3] sm:$0xff] }
  0x40   :  { %v64_v49 = vld [vmem:[#allocation3 + $0x20] sm:$0xff] }
  0x41   :  { %2015 = vmatpush1.bf16.msra.mxu0 %v3624_v26  ;;  %v3656_v52 = vld [vmem:[#allocation5 + $0x164] ss:$16 sps:$4 sm:$0xff]   ;;  %v4142_v53 = vcombine.high %v60_v48, %v64_v49  ;;  %v3660_v56 = vld [vmem:[#allocation5 + $0x160] ss:$16 sps:$4 sm:$0xff]   ;;  %v4148_v11 = vcombine.low %v60_v48, %v64_v49 }
  0x42   :  { %2128 = vmatpush1.bf16.msra.mxu1 %v3625_v27  ;;  %2016 = vmatprep.subr.bf16.mxu0 %v3626_v28  ;;  %v3658_v54 = vld [vmem:[#allocation5 + $0x364] ss:$16 sps:$4 sm:$0xff]   ;;  %v3661_v57 = vld [vmem:[#allocation5 + $0x360] ss:$16 sps:$4 sm:$0xff]  }
  0x43   :  { %2129 = vmatprep.subr.bf16.mxu1 %v3628_v29  ;;  %2034 = vmatprep.mubr.bf16.mxu0 %v4142_v53  ;;  %v3662_v58 = vld [vmem:[#allocation5 + $0x144] ss:$16 sps:$4 sm:$0xff]   ;;  %v3666_v60 = vld [vmem:[#allocation5 + $0x140] ss:$16 sps:$4 sm:$0xff]   ;;  %v4162_v29 = vcombine.low %v69_v14, %v73_v15 }
  0x44   :  { %v3664_v59 = vld [vmem:[#allocation5 + $0x344] ss:$16 sps:$4 sm:$0xff]   ;;  %v3667_v61 = vld [vmem:[#allocation5 + $0x340] ss:$16 sps:$4 sm:$0xff]  }
  0x45   :  { %2017 = vmatpush1.bf16.msra.mxu0 %v3630_v30  ;;  %v3668_v62 = vld [vmem:[#allocation5 + $0x124] ss:$16 sps:$4 sm:$0xff]   ;;  %v3672_v0 = vld [vmem:[#allocation5 + $0x120] ss:$16 sps:$4 sm:$0xff]   ;;  %v77_v30 = vld [vmem:[#allocation3 + $0x88] sm:$0xff] }
  0x46   :  { %2130 = vmatpush1.bf16.msra.mxu1 %v3631_v31  ;;  %2018 = vmatprep.subr.bf16.mxu0 %v3632_v32  ;;  %v3670_v63 = vld [vmem:[#allocation5 + $0x324] ss:$16 sps:$4 sm:$0xff]   ;;  %v3673_v1 = vld [vmem:[#allocation5 + $0x320] ss:$16 sps:$4 sm:$0xff]   ;;  %v81_v31 = vld [vmem:[#allocation3 + $0xa8] sm:$0xff] }
  0x47   :  { %2131 = vmatprep.subr.bf16.mxu1 %v3634_v33  ;;  %v3674_v2 = vld [vmem:[#allocation5 + $0x104] ss:$16 sps:$4 sm:$0xff]   ;;  %v3678_v4 = vld [vmem:[#allocation5 + $0x100] ss:$16 sps:$4 sm:$0xff]  }
  0x48   :  { %v3676_v3 = vld [vmem:[#allocation5 + $0x304] ss:$16 sps:$4 sm:$0xff]   ;;  %v3679_v5 = vld [vmem:[#allocation5 + $0x300] ss:$16 sps:$4 sm:$0xff]  }
  0x49   :  { %2019 = vmatpush2.bf16.msra.mxu0 %v3636_v34  ;;  %v3682_v6 = vld [vmem:[#allocation5 + $0x4e4] ss:$16 sps:$4 sm:$0xff]   ;;  %v3680_v8 = vld [vmem:[#allocation5 + $0x4e0] ss:$16 sps:$4 sm:$0xff]  }
  0x4a   :  { %2132 = vmatpush2.bf16.msra.mxu1 %v3637_v35  ;;  %2020 = vmatprep.subr.bf16.mxu0 %v3638_v36  ;;  %v3685_v7 = vld [vmem:[#allocation5 + $0x6e4] ss:$16 sps:$4 sm:$0xff]   ;;  %v3683_v9 = vld [vmem:[#allocation5 + $0x6e0] ss:$16 sps:$4 sm:$0xff]   ;;  %v4166_v35 = vcombine.high %v77_v30, %v81_v31 }
  0x4b   :  { %2133 = vmatprep.subr.bf16.mxu1 %v3640_v37  ;;  %v68_v10 = vld [vmem:[#allocation3 + $0x40] sm:$0xff] }
  0x4c   :  { %v72_v13 = vld [vmem:[#allocation3 + $0x60] sm:$0xff] }
  0x4d   :  { %2021 = vmatpush2.bf16.msra.mxu0 %v3642_v38  ;;  %v3688_v16 = vld [vmem:[#allocation5 + $0x4c4] ss:$16 sps:$4 sm:$0xff]   ;;  %v4152_v18 = vcombine.high %v68_v10, %v72_v13  ;;  %v3686_v20 = vld [vmem:[#allocation5 + $0x4c0] ss:$16 sps:$4 sm:$0xff]   ;;  %v4160_v28 = vcombine.low %v68_v10, %v72_v13 }
  0x4e   :  { %2134 = vmatpush2.bf16.msra.mxu1 %v3643_v39  ;;  %2022 = vmatprep.subr.bf16.mxu0 %v3644_v40  ;;  %v3691_v17 = vld [vmem:[#allocation5 + $0x6c4] ss:$16 sps:$4 sm:$0xff]   ;;  %v3689_v21 = vld [vmem:[#allocation5 + $0x6c0] ss:$16 sps:$4 sm:$0xff]  }
  0x4f   :  { %2135 = vmatprep.subr.bf16.mxu1 %v3646_v41  ;;  %v3694_v22 = vld [vmem:[#allocation5 + $0x4a4] ss:$16 sps:$4 sm:$0xff]   ;;  %v3692_v24 = vld [vmem:[#allocation5 + $0x4a0] ss:$16 sps:$4 sm:$0xff]  }
  0x50   :  { %v3697_v23 = vld [vmem:[#allocation5 + $0x6a4] ss:$16 sps:$4 sm:$0xff]   ;;  %v3695_v25 = vld [vmem:[#allocation5 + $0x6a0] ss:$16 sps:$4 sm:$0xff]  }
  0x51   :  { %2023 = vmatpush2.bf16.msra.mxu0 %v3648_v42  ;;  %v76_v26 = vld [vmem:[#allocation3 + $0x80] sm:$0xff] }
  0x52   :  { %2136 = vmatpush2.bf16.msra.mxu1 %v3649_v43  ;;  %2024 = vmatprep.subr.bf16.mxu0 %v3650_v44  ;;  %v80_v27 = vld [vmem:[#allocation3 + $0xa0] sm:$0xff] }
  0x53   :  { %2137 = vmatprep.subr.bf16.mxu1 %v3652_v45  ;;  %v3700_v32 = vld [vmem:[#allocation5 + $0x484] ss:$16 sps:$4 sm:$0xff]   ;;  %v4164_v34 = vcombine.high %v76_v26, %v80_v27  ;;  %v3698_v36 = vld [vmem:[#allocation5 + $0x480] ss:$16 sps:$4 sm:$0xff]   ;;  %v4172_v44 = vcombine.low %v76_v26, %v80_v27  ;;  %v4174_v45 = vcombine.low %v77_v30, %v81_v31 }
  0x54   :  { %v3703_v33 = vld [vmem:[#allocation5 + $0x684] ss:$16 sps:$4 sm:$0xff]   ;;  %v3701_v37 = vld [vmem:[#allocation5 + $0x680] ss:$16 sps:$4 sm:$0xff]  }
  0x55   :  { %2025 = vmatpush2.bf16.msra.mxu0 %v3654_v46  ;;  %v3706_v38 = vld [vmem:[#allocation5 + $0x464] ss:$16 sps:$4 sm:$0xff]   ;;  %v3704_v40 = vld [vmem:[#allocation5 + $0x460] ss:$16 sps:$4 sm:$0xff]   ;;  %v85_v46 = vld [vmem:[#allocation3 + $0xc8] sm:$0xff] }
  0x56   :  { %2138 = vmatpush2.bf16.msra.mxu1 %v3655_v47  ;;  %2026 = vmatprep.subr.bf16.mxu0 %v3656_v52  ;;  %v3709_v39 = vld [vmem:[#allocation5 + $0x664] ss:$16 sps:$4 sm:$0xff]   ;;  %v3707_v41 = vld [vmem:[#allocation5 + $0x660] ss:$16 sps:$4 sm:$0xff]   ;;  %v89_v47 = vld [vmem:[#allocation3 + $0xe8] sm:$0xff] }
  0x57   :  { %2139 = vmatprep.subr.bf16.mxu1 %v3658_v54  ;;  %v84_v42 = vld [vmem:[#allocation3 + $0xc0] sm:$0xff]  ;;  %v4178_v51 = vcombine.high %v85_v46, %v89_v47 }
  0x58   :  { %v88_v43 = vld [vmem:[#allocation3 + $0xe0] sm:$0xff] }
  0x59   :  { %2027 = vmatpush2.bf16.msra.mxu0 %v3660_v56  ;;  %v3712_v48 = vld [vmem:[#allocation5 + $0x444] ss:$16 sps:$4 sm:$0xff]   ;;  %v4176_v50 = vcombine.high %v84_v42, %v88_v43  ;;  %v3710_v52 = vld [vmem:[#allocation5 + $0x440] ss:$16 sps:$4 sm:$0xff]  }
  0x5a   :  { %2140 = vmatpush2.bf16.msra.mxu1 %v3661_v57  ;;  %2028 = vmatprep.subr.bf16.mxu0 %v3662_v58  ;;  %v3715_v49 = vld [vmem:[#allocation5 + $0x644] ss:$16 sps:$4 sm:$0xff]   ;;  %v3713_v54 = vld [vmem:[#allocation5 + $0x640] ss:$16 sps:$4 sm:$0xff]  }
  0x5b   :  { %2141 = vmatprep.subr.bf16.mxu1 %v3664_v59  ;;  %v3718_v56 = vld [vmem:[#allocation5 + $0x424] ss:$16 sps:$4 sm:$0xff]   ;;  %v3716_v58 = vld [vmem:[#allocation5 + $0x420] ss:$16 sps:$4 sm:$0xff]  }
  0x5c   :  { %v3721_v57 = vld [vmem:[#allocation5 + $0x624] ss:$16 sps:$4 sm:$0xff]   ;;  %v3734_v26 = vld [vmem:[#allocation5 + $0x5c0] ss:$16 sps:$4 sm:$0xff]  }
  0x5d   :  { %2029 = vmatpush2.bf16.msra.mxu0 %v3666_v60  ;;  %v92_v59 = vld [vmem:[#allocation3 + $0x100] sm:$0xff] }
  0x5e   :  { %2142 = vmatpush2.bf16.msra.mxu1 %v3667_v61  ;;  %2030 = vmatprep.subr.bf16.mxu0 %v3668_v62  ;;  %v96_v60 = vld [vmem:[#allocation3 + $0x120] sm:$0xff]  ;;  %v4184_v61 = vcombine.low %v84_v42, %v88_v43  ;;  %v4186_v62 = vcombine.low %v85_v46, %v89_v47 }
  0x5f   :  { %2143 = vmatprep.subr.bf16.mxu1 %v3670_v63  ;;  %v93_v63 = vld [vmem:[#allocation3 + $0x108] sm:$0xff]  ;;  %v100_v10 = vld [vmem:[#allocation3 + $0x140] sm:$0xff]  ;;  %v4196_v14 = vcombine.low %v92_v59, %v96_v60 }
  0x60   :  { %v104_v13 = vld [vmem:[#allocation3 + $0x160] sm:$0xff] }
  0x61   :  { %2031 = vmatpush2.bf16.msra.mxu0 %v3672_v0  ;;  %v97_v0 = vld [vmem:[#allocation3 + $0x128] sm:$0xff]  ;;  %v3737_v27 = vld [vmem:[#allocation5 + $0x7c0] ss:$16 sps:$4 sm:$0xff]   ;;  %v3742_v30 = vld [vmem:[#allocation5 + $0x5a4] ss:$16 sps:$4 sm:$0xff]  }
  0x62   :  { %2144 = vmatpush2.bf16.msra.mxu1 %v3673_v1  ;;  %2032 = vmatprep.subr.bf16.mxu0 %v3674_v2  ;;  %v3719_v1 = vld [vmem:[#allocation5 + $0x620] ss:$16 sps:$4 sm:$0xff]   ;;  %v3724_v2 = vld [vmem:[#allocation5 + $0x404] ss:$16 sps:$4 sm:$0xff]   ;;  %v4198_v15 = vcombine.low %v93_v63, %v97_v0 }
  0x63   :  { %2145 = vmatprep.subr.bf16.mxu1 %v3676_v3  ;;  %v3727_v3 = vld [vmem:[#allocation5 + $0x604] ss:$16 sps:$4 sm:$0xff]  }
  0x64   :  { %v3745_v31 = vld [vmem:[#allocation5 + $0x7a4] ss:$16 sps:$4 sm:$0xff]  }
  0x65   :  { %2033 = vmatpush2.bf16.msra.mxu0 %v3678_v4  ;;  %v4188_v4 = vcombine.high %v92_v59, %v96_v60  ;;  %v3748_v42 = vld [vmem:[#allocation5 + $0x584] ss:$16 sps:$4 sm:$0xff]  }
  0x66   :  { %2146 = vmatpush2.bf16.msra.mxu1 %v3679_v5  ;;  %2228 = vmatprep.subr.bf16.mxu0 %v3682_v6  ;;  %v4190_v5 = vcombine.high %v93_v63, %v97_v0  ;;  %v3722_v6 = vld [vmem:[#allocation5 + $0x400] ss:$16 sps:$4 sm:$0xff]   ;;  %v3751_v43 = vld [vmem:[#allocation5 + $0x784] ss:$16 sps:$4 sm:$0xff]   ;;  %v117_v0 = vld [vmem:[#allocation3 + $0x1c8] sm:$0xff] }
  0x67   :  { %2341 = vmatprep.subr.bf16.mxu1 %v3685_v7  ;;  %v3725_v7 = vld [vmem:[#allocation5 + $0x600] ss:$16 sps:$4 sm:$0xff]  }
  0x68   :  { %2035 = vmatmul.mubr.bf16.vlgmr.msra.gmra.mxu0 %v4148_v11  ;;  %v120_v59 = vld [vmem:[#allocation3 + $0x1e0] sm:$0xff] }
  0x69   :  { %2148 = vmatmul.mubr.bf16.vlgmr.msra.gmra.mxu1 %v4150_v12  ;;  %2229 = vmatpush1.bf16.msra.mxu0 %v3680_v8  ;;  %v3730_v8 = vld [vmem:[#allocation5 + $0x5e4] ss:$16 sps:$4 sm:$0xff]  }
  0x6a   :  { %2342 = vmatpush1.bf16.msra.mxu1 %v3683_v9  ;;  %2230 = vmatprep.subr.bf16.mxu0 %v3688_v16  ;;  %v3733_v9 = vld [vmem:[#allocation5 + $0x7e4] ss:$16 sps:$4 sm:$0xff]   ;;  %v101_v16 = vld [vmem:[#allocation3 + $0x148] sm:$0xff] }
  0x6b   :  { %2343 = vmatprep.subr.bf16.mxu1 %v3691_v17  ;;  %2044 = vmatprep.mubr.bf16.mxu0 %v4152_v18  ;;  %v105_v17 = vld [vmem:[#allocation3 + $0x168] sm:$0xff] }
  0x6c   :  { %2157 = vmatprep.mubr.bf16.mxu1 %v4154_v19 }
  0x6d   :  { %2231 = vmatpush1.bf16.msra.mxu0 %v3686_v20  ;;  %v3728_v20 = vld [vmem:[#allocation5 + $0x5e0] ss:$16 sps:$4 sm:$0xff]  }
  0x6e   :  { %2344 = vmatpush1.bf16.msra.mxu1 %v3689_v21  ;;  %2232 = vmatprep.subr.bf16.mxu0 %v3694_v22  ;;  %v3731_v21 = vld [vmem:[#allocation5 + $0x7e0] ss:$16 sps:$4 sm:$0xff]   ;;  %v3736_v22 = vld [vmem:[#allocation5 + $0x5c4] ss:$16 sps:$4 sm:$0xff]  }
  0x6f   :  { %2345 = vmatprep.subr.bf16.mxu1 %v3697_v23  ;;  %v3739_v23 = vld [vmem:[#allocation5 + $0x7c4] ss:$16 sps:$4 sm:$0xff]  }
  0x70   :  { %2045 = vmatmul.mubr.bf16.gmra.mxu0 %v4160_v28 }
  0x71   :  { %2158 = vmatmul.mubr.bf16.gmra.mxu1 %v4162_v29  ;;  %2233 = vmatpush1.bf16.msra.mxu0 %v3692_v24  ;;  %v4200_v24 = vcombine.high %v100_v10, %v104_v13 }
  0x72   :  { %2346 = vmatpush1.bf16.msra.mxu1 %v3695_v25  ;;  %2234 = vmatprep.subr.bf16.mxu0 %v3700_v32  ;;  %v4202_v25 = vcombine.high %v101_v16, %v105_v17  ;;  %v3740_v32 = vld [vmem:[#allocation5 + $0x5a0] ss:$16 sps:$4 sm:$0xff]  }
  0x73   :  { %2347 = vmatprep.subr.bf16.mxu1 %v3703_v33  ;;  %2054 = vmatprep.mubr.bf16.mxu0 %v4164_v34  ;;  %v3743_v33 = vld [vmem:[#allocation5 + $0x7a0] ss:$16 sps:$4 sm:$0xff]  }
  0x74   :  { %2167 = vmatprep.mubr.bf16.mxu1 %v4166_v35 }
  0x75   :  { %2235 = vmatpush1.bf16.msra.mxu0 %v3698_v36  ;;  %v108_v36 = vld [vmem:[#allocation3 + $0x180] sm:$0xff] }
  0x76   :  { %2348 = vmatpush1.bf16.msra.mxu1 %v3701_v37  ;;  %2236 = vmatprep.subr.bf16.mxu0 %v3706_v38  ;;  %v4208_v37 = vcombine.low %v100_v10, %v104_v13  ;;  %v4210_v38 = vcombine.low %v101_v16, %v105_v17  ;;  %v3766_v10 = vld [vmem:[#allocation5 + $0x524] ss:$16 sps:$4 sm:$0xff]   ;;  %v3764_v16 = vld [vmem:[#allocation5 + $0x520] ss:$16 sps:$4 sm:$0xff]  }
  0x77   :  { %2349 = vmatprep.subr.bf16.mxu1 %v3709_v39  ;;  %v112_v39 = vld [vmem:[#allocation3 + $0x1a0] sm:$0xff] }
  0x78   :  { %2055 = vmatmul.mubr.bf16.gmra.mxu0 %v4172_v44  ;;  %v4212_v46 = vcombine.high %v108_v36, %v112_v39  ;;  %v4220_v60 = vcombine.low %v108_v36, %v112_v39  ;;  %v3769_v13 = vld [vmem:[#allocation5 + $0x724] ss:$16 sps:$4 sm:$0xff]   ;;  %v3767_v17 = vld [vmem:[#allocation5 + $0x720] ss:$16 sps:$4 sm:$0xff]  }
  0x79   :  { %2168 = vmatmul.mubr.bf16.gmra.mxu1 %v4174_v45  ;;  %2237 = vmatpush1.bf16.msra.mxu0 %v3704_v40  ;;  %v109_v40 = vld [vmem:[#allocation3 + $0x188] sm:$0xff]  ;;  %v3770_v36 = vld [vmem:[#allocation5 + $0x500] ss:$16 sps:$4 sm:$0xff]  }
  0x7a   :  { %2350 = vmatpush1.bf16.msra.mxu1 %v3707_v41  ;;  %2238 = vmatprep.subr.bf16.mxu0 %v3712_v48  ;;  %v113_v41 = vld [vmem:[#allocation3 + $0x1a8] sm:$0xff]  ;;  %v3746_v48 = vld [vmem:[#allocation5 + $0x580] ss:$16 sps:$4 sm:$0xff]  }
  0x7b   :  { %2351 = vmatprep.subr.bf16.mxu1 %v3715_v49  ;;  %2064 = vmatprep.mubr.bf16.mxu0 %v4176_v50  ;;  %v4214_v47 = vcombine.high %v109_v40, %v113_v41  ;;  %v3749_v49 = vld [vmem:[#allocation5 + $0x780] ss:$16 sps:$4 sm:$0xff]   ;;  %v4222_v63 = vcombine.low %v109_v40, %v113_v41  ;;  %v3778_v40 = vld [vmem:[#allocation5 + $0xec] ss:$16 sps:$4 sm:$0xff]  }
  0x7c   :  { %2177 = vmatprep.mubr.bf16.mxu1 %v4178_v51  ;;  %v3773_v39 = vld [vmem:[#allocation5 + $0x700] ss:$16 sps:$4 sm:$0xff]   ;;  %v3781_v41 = vld [vmem:[#allocation5 + $0x2ec] ss:$16 sps:$4 sm:$0xff]  }
  0x7d   :  { %2239 = vmatpush1.bf16.msra.mxu0 %v3710_v52  ;;  %v3754_v52 = vld [vmem:[#allocation5 + $0x564] ss:$16 sps:$4 sm:$0xff]  }
  0x7e   :  { %2352 = vmatpush1.bf16.msra.mxu1 %v3713_v54  ;;  %2240 = vmatprep.subr.bf16.mxu0 %v3718_v56  ;;  %v3757_v54 = vld [vmem:[#allocation5 + $0x764] ss:$16 sps:$4 sm:$0xff]   ;;  %v3752_v56 = vld [vmem:[#allocation5 + $0x560] ss:$16 sps:$4 sm:$0xff]  }
  0x7f   :  { %2353 = vmatprep.subr.bf16.mxu1 %v3721_v57  ;;  %v3755_v57 = vld [vmem:[#allocation5 + $0x760] ss:$16 sps:$4 sm:$0xff]  }
  0x80   :  { %2065 = vmatmul.mubr.bf16.gmra.mxu0 %v4184_v61 }
  0x81   :  { %2178 = vmatmul.mubr.bf16.gmra.mxu1 %v4186_v62  ;;  %2241 = vmatpush1.bf16.msra.mxu0 %v3716_v58  ;;  %v116_v58 = vld [vmem:[#allocation3 + $0x1c0] sm:$0xff] }
  0x82   :  { %2354 = vmatpush1.bf16.msra.mxu1 %v3719_v1  ;;  %2242 = vmatprep.subr.bf16.mxu0 %v3724_v2  ;;  %v121_v1 = vld [vmem:[#allocation3 + $0x1e8] sm:$0xff]  ;;  %v3760_v2 = vld [vmem:[#allocation5 + $0x544] ss:$16 sps:$4 sm:$0xff]  }
  0x83   :  { %2355 = vmatprep.subr.bf16.mxu1 %v3727_v3  ;;  %2074 = vmatprep.mubr.bf16.mxu0 %v4188_v4  ;;  %v3763_v3 = vld [vmem:[#allocation5 + $0x744] ss:$16 sps:$4 sm:$0xff]  }
  0x84   :  { %2187 = vmatprep.mubr.bf16.mxu1 %v4190_v5 }
  0x85   :  { %2243 = vmatpush1.bf16.msra.mxu0 %v3722_v6  ;;  %v4224_v6 = vcombine.high %v116_v58, %v120_v59 }
  0x86   :  { %2356 = vmatpush1.bf16.msra.mxu1 %v3725_v7  ;;  %2244 = vmatprep.subr.bf16.mxu0 %v3730_v8  ;;  %v4226_v7 = vcombine.high %v117_v0, %v121_v1  ;;  %v3758_v8 = vld [vmem:[#allocation5 + $0x540] ss:$16 sps:$4 sm:$0xff]  }
  0x87   :  { %2357 = vmatprep.subr.bf16.mxu1 %v3733_v9  ;;  %v3761_v9 = vld [vmem:[#allocation5 + $0x740] ss:$16 sps:$4 sm:$0xff]  }
  0x88   :  { %2075 = vmatmul.mubr.bf16.gmra.mxu0 %v4196_v14 }
  0x89   :  { %2188 = vmatmul.mubr.bf16.gmra.mxu1 %v4198_v15  ;;  %2245 = vmatpush2.bf16.msra.mxu0 %v3728_v20  ;;  %v62_v20 = vld [vmem:[#allocation3 + $0x10] sm:$0xff] }
  0x8a   :  { %2358 = vmatpush2.bf16.msra.mxu1 %v3731_v21  ;;  %2246 = vmatprep.subr.bf16.mxu0 %v3736_v22  ;;  %v66_v21 = vld [vmem:[#allocation3 + $0x30] sm:$0xff]  ;;  %v4232_v22 = vcombine.low %v116_v58, %v120_v59  ;;  %v3784_v58 = vld [vmem:[#allocation5 + $0xcc] ss:$16 sps:$4 sm:$0xff]  }
  0x8b   :  { %2359 = vmatprep.subr.bf16.mxu1 %v3739_v23  ;;  %2084 = vmatprep.mubr.bf16.mxu0 %v4200_v24  ;;  %v4234_v23 = vcombine.low %v117_v0, %v121_v1  ;;  %v3787_v59 = vld [vmem:[#allocation5 + $0x2cc] ss:$16 sps:$4 sm:$0xff]  }
  0x8c   :  { %2197 = vmatprep.mubr.bf16.mxu1 %v4202_v25 }
  0x8d   :  { %2247 = vmatpush2.bf16.msra.mxu0 %v3734_v26  ;;  %v63_v26 = vld [vmem:[#allocation3 + $0x18] sm:$0xff] }
  0x8e   :  { %2360 = vmatpush2.bf16.msra.mxu1 %v3737_v27  ;;  %2248 = vmatprep.subr.bf16.mxu0 %v3742_v30  ;;  %v67_v27 = vld [vmem:[#allocation3 + $0x38] sm:$0xff]  ;;  %v3772_v30 = vld [vmem:[#allocation5 + $0x504] ss:$16 sps:$4 sm:$0xff]  }
  0x8f   :  { %2361 = vmatprep.subr.bf16.mxu1 %v3745_v31  ;;  %v3775_v31 = vld [vmem:[#allocation5 + $0x704] ss:$16 sps:$4 sm:$0xff]  }
  0x90   :  { %2085 = vmatmul.mubr.bf16.gmra.mxu0 %v4208_v37 }
  0x91   :  { %2198 = vmatmul.mubr.bf16.gmra.mxu1 %v4210_v38  ;;  %2249 = vmatpush2.bf16.msra.mxu0 %v3740_v32  ;;  %v4236_v32 = vcombine.high %v62_v20, %v66_v21 }
  0x92   :  { %2362 = vmatpush2.bf16.msra.mxu1 %v3743_v33  ;;  %2250 = vmatprep.subr.bf16.mxu0 %v3748_v42  ;;  %v4238_v33 = vcombine.high %v63_v26, %v67_v27  ;;  %v3776_v42 = vld [vmem:[#allocation5 + $0xe8] ss:$16 sps:$4 sm:$0xff]  }
  0x93   :  { %2363 = vmatprep.subr.bf16.mxu1 %v3751_v43  ;;  %2094 = vmatprep.mubr.bf16.mxu0 %v4212_v46  ;;  %v70_v43 = vld [vmem:[#allocation3 + $0x50] sm:$0xff] }
  0x94   :  { %2207 = vmatprep.mubr.bf16.mxu1 %v4214_v47 }
  0x95   :  { %2251 = vmatpush2.bf16.msra.mxu0 %v3746_v48  ;;  %v74_v48 = vld [vmem:[#allocation3 + $0x70] sm:$0xff] }
  0x96   :  { %2364 = vmatpush2.bf16.msra.mxu1 %v3749_v49  ;;  %2252 = vmatprep.subr.bf16.mxu0 %v3754_v52  ;;  %v4244_v49 = vcombine.low %v62_v20, %v66_v21  ;;  %v4246_v52 = vcombine.low %v63_v26, %v67_v27  ;;  %v4248_v0 = vcombine.high %v70_v43, %v74_v48  ;;  %v79_v20 = vld [vmem:[#allocation3 + $0x98] sm:$0xff] }
  0x97   :  { %2365 = vmatprep.subr.bf16.mxu1 %v3757_v54  ;;  %v71_v54 = vld [vmem:[#allocation3 + $0x58] sm:$0xff] }
  0x98   :  { %2095 = vmatmul.mubr.bf16.gmra.mxu0 %v4220_v60  ;;  %v83_v21 = vld [vmem:[#allocation3 + $0xb8] sm:$0xff] }
  0x99   :  { %2208 = vmatmul.mubr.bf16.gmra.mxu1 %v4222_v63  ;;  %2253 = vmatpush2.bf16.msra.mxu0 %v3752_v56  ;;  %v75_v56 = vld [vmem:[#allocation3 + $0x78] sm:$0xff] }
  0x9a   :  { %2366 = vmatpush2.bf16.msra.mxu1 %v3755_v57  ;;  %2254 = vmatprep.subr.bf16.mxu0 %v3760_v2  ;;  %v3779_v57 = vld [vmem:[#allocation5 + $0x2e8] ss:$16 sps:$4 sm:$0xff]   ;;  %v4250_v1 = vcombine.high %v71_v54, %v75_v56 }
  0x9b   :  { %2367 = vmatprep.subr.bf16.mxu1 %v3763_v3  ;;  %2104 = vmatprep.mubr.bf16.mxu0 %v4224_v6  ;;  %v3782_v2 = vld [vmem:[#allocation5 + $0xc8] ss:$16 sps:$4 sm:$0xff]  }
  0x9c   :  { %2217 = vmatprep.mubr.bf16.mxu1 %v4226_v7  ;;  %v3785_v3 = vld [vmem:[#allocation5 + $0x2c8] ss:$16 sps:$4 sm:$0xff]  }
  0x9d   :  { %2255 = vmatpush2.bf16.msra.mxu0 %v3758_v8  ;;  %v3790_v8 = vld [vmem:[#allocation5 + $0xac] ss:$16 sps:$4 sm:$0xff]   ;;  %v3788_v26 = vld [vmem:[#allocation5 + $0xa8] ss:$16 sps:$4 sm:$0xff]  }
  0x9e   :  { %2368 = vmatpush2.bf16.msra.mxu1 %v3761_v9  ;;  %2256 = vmatprep.subr.bf16.mxu0 %v3766_v10  ;;  %v3793_v9 = vld [vmem:[#allocation5 + $0x2ac] ss:$16 sps:$4 sm:$0xff]   ;;  %v78_v10 = vld [vmem:[#allocation3 + $0x90] sm:$0xff]  ;;  %v3791_v27 = vld [vmem:[#allocation5 + $0x2a8] ss:$16 sps:$4 sm:$0xff]  }
  0x9f   :  { %2369 = vmatprep.subr.bf16.mxu1 %v3769_v13  ;;  %v82_v13 = vld [vmem:[#allocation3 + $0xb0] sm:$0xff] }
  0xa0   :  { %2105 = vmatmul.mubr.bf16.gmra.mxu0 %v4232_v22 }
  0xa1   :  { %2218 = vmatmul.mubr.bf16.gmra.mxu1 %v4234_v23  ;;  %2257 = vmatpush2.bf16.msra.mxu0 %v3764_v16  ;;  %v4256_v16 = vcombine.low %v70_v43, %v74_v48  ;;  %v3805_v43 = vld [vmem:[#allocation5 + $0x26c] ss:$16 sps:$4 sm:$0xff]   ;;  %v3800_v48 = vld [vmem:[#allocation5 + $0x68] ss:$16 sps:$4 sm:$0xff]  }
  0xa2   :  { %2370 = vmatpush2.bf16.msra.mxu1 %v3767_v17  ;;  %2258 = vmatprep.subr.bf16.mxu0 %v3772_v30  ;;  %v4258_v17 = vcombine.low %v71_v54, %v75_v56  ;;  %v3796_v30 = vld [vmem:[#allocation5 + $0x8c] ss:$16 sps:$4 sm:$0xff]   ;;  %v3803_v54 = vld [vmem:[#allocation5 + $0x268] ss:$16 sps:$4 sm:$0xff]   ;;  %v86_v56 = vld [vmem:[#allocation3 + $0xd0] sm:$0xff] }
  0xa3   :  { %2371 = vmatprep.subr.bf16.mxu1 %v3775_v31  ;;  %2260 = vmatprep.mubr.bf16.mxu0 %v4236_v32  ;;  %v3799_v31 = vld [vmem:[#allocation5 + $0x28c] ss:$16 sps:$4 sm:$0xff]  }
  0xa4   :  { %2373 = vmatprep.mubr.bf16.mxu1 %v4238_v33 }
  0xa5   :  { %2259 = vmatpush2.bf16.msra.mxu0 %v3770_v36  ;;  %v4260_v36 = vcombine.high %v78_v10, %v82_v13 }
  0xa6   :  { %2372 = vmatpush2.bf16.msra.mxu1 %v3773_v39  ;;  %2454 = vmatprep.subr.bf16.mxu0 %v3778_v40  ;;  %v4262_v39 = vcombine.high %v79_v20, %v83_v21  ;;  %v3794_v40 = vld [vmem:[#allocation5 + $0x88] ss:$16 sps:$4 sm:$0xff]  }
  0xa7   :  { %2567 = vmatprep.subr.bf16.mxu1 %v3781_v41  ;;  %v3797_v41 = vld [vmem:[#allocation5 + $0x288] ss:$16 sps:$4 sm:$0xff]  }
  0xa8   :  { %2261 = vmatmul.mubr.bf16.vlgmr.msra.gmra.mxu0 %v4244_v49 }
  0xa9   :  { %2374 = vmatmul.mubr.bf16.vlgmr.msra.gmra.mxu1 %v4246_v52  ;;  %2455 = vmatpush1.bf16.msra.mxu0 %v3776_v42  ;;  %v3802_v42 = vld [vmem:[#allocation5 + $0x6c] ss:$16 sps:$4 sm:$0xff]  }
  0xaa   :  { %2568 = vmatpush1.bf16.msra.mxu1 %v3779_v57  ;;  %2456 = vmatprep.subr.bf16.mxu0 %v3784_v58  ;;  %v4268_v57 = vcombine.low %v78_v10, %v82_v13  ;;  %v4270_v58 = vcombine.low %v79_v20, %v83_v21  ;;  %v3806_v10 = vld [vmem:[#allocation5 + $0x48] ss:$16 sps:$4 sm:$0xff]   ;;  %v3814_v20 = vld [vmem:[#allocation5 + $0x2c] ss:$16 sps:$4 sm:$0xff]  }
  0xab   :  { %2569 = vmatprep.subr.bf16.mxu1 %v3787_v59  ;;  %2270 = vmatprep.mubr.bf16.mxu0 %v4248_v0  ;;  %v90_v59 = vld [vmem:[#allocation3 + $0xf0] sm:$0xff]  ;;  %v3809_v13 = vld [vmem:[#allocation5 + $0x248] ss:$16 sps:$4 sm:$0xff]   ;;  %v3817_v21 = vld [vmem:[#allocation5 + $0x22c] ss:$16 sps:$4 sm:$0xff]  }
  0xac   :  { %2383 = vmatprep.mubr.bf16.mxu1 %v4250_v1  ;;  %5013 = vst [vmem:[#allocation10_spill] sm:$0xff] %v4268_v57  ;;  %5014 = vst [vmem:[#allocation11_spill] sm:$0xff] %v4270_v58 }
  0xad   :  { %2457 = vmatpush1.bf16.msra.mxu0 %v3782_v2  ;;  %v87_v2 = vld [vmem:[#allocation3 + $0xd8] sm:$0xff] }
  0xae   :  { %2570 = vmatpush1.bf16.msra.mxu1 %v3785_v3  ;;  %2458 = vmatprep.subr.bf16.mxu0 %v3790_v8  ;;  %v91_v3 = vld [vmem:[#allocation3 + $0xf8] sm:$0xff] }
  0xaf   :  { %2571 = vmatprep.subr.bf16.mxu1 %v3793_v9  ;;  %v3808_v8 = vld [vmem:[#allocation5 + $0x4c] ss:$16 sps:$4 sm:$0xff]  }
  0xb0   :  { %2271 = vmatmul.mubr.bf16.gmra.mxu0 %v4256_v16  ;;  %v3811_v9 = vld [vmem:[#allocation5 + $0x24c] ss:$16 sps:$4 sm:$0xff]  }
  0xb1   :  { %2384 = vmatmul.mubr.bf16.gmra.mxu1 %v4258_v17  ;;  %2459 = vmatpush1.bf16.msra.mxu0 %v3788_v26  ;;  %v4272_v26 = vcombine.high %v86_v56, %v90_v59 }
  0xb2   :  { %2572 = vmatpush1.bf16.msra.mxu1 %v3791_v27  ;;  %2460 = vmatprep.subr.bf16.mxu0 %v3796_v30  ;;  %v4274_v27 = vcombine.high %v87_v2, %v91_v3  ;;  %v3812_v30 = vld [vmem:[#allocation5 + $0x28] ss:$16 sps:$4 sm:$0xff]  }
  0xb3   :  { %2573 = vmatprep.subr.bf16.mxu1 %v3799_v31  ;;  %2280 = vmatprep.mubr.bf16.mxu0 %v4260_v36  ;;  %5015 = vst [vmem:[#allocation12_spill] sm:$0xff] %v4272_v26  ;;  %v3815_v31 = vld [vmem:[#allocation5 + $0x228] ss:$16 sps:$4 sm:$0xff]  }
  0xb4   :  { %2393 = vmatprep.mubr.bf16.mxu1 %v4262_v39  ;;  %5016 = vst [vmem:[#allocation13_spill] sm:$0xff] %v4274_v27 }
  0xb5   :  { %2461 = vmatpush1.bf16.msra.mxu0 %v3794_v40  ;;  %v94_v40 = vld [vmem:[#allocation3 + $0x110] sm:$0xff] }
  0xb6   :  { %2574 = vmatpush1.bf16.msra.mxu1 %v3797_v41  ;;  %2462 = vmatprep.subr.bf16.mxu0 %v3802_v42  ;;  %v98_v41 = vld [vmem:[#allocation3 + $0x130] sm:$0xff]  ;;  %v4280_v42 = vcombine.low %v86_v56, %v90_v59  ;;  %v3818_v56 = vld [vmem:[#allocation5 + $0x8] ss:$16 sps:$4 sm:$0xff]  }
  0xb7   :  { %2575 = vmatprep.subr.bf16.mxu1 %v3805_v43  ;;  %v4282_v43 = vcombine.low %v87_v2, %v91_v3  ;;  %v3821_v59 = vld [vmem:[#allocation5 + $0x208] ss:$16 sps:$4 sm:$0xff]   ;;  %v3826_v2 = vld [vmem:[#allocation5 + $0x1ec] ss:$16 sps:$4 sm:$0xff]  }
  0xb8   :  { %2281 = vmatmul.mubr.bf16.gmra.mxu0 %v4268_v57  ;;  %5017 = vst [vmem:[#allocation14_spill] sm:$0xff] %v4280_v42  ;;  %v99_v57 = vld [vmem:[#allocation3 + $0x138] sm:$0xff] }
  0xb9   :  { %2394 = vmatmul.mubr.bf16.gmra.mxu1 %v4270_v58  ;;  %2463 = vmatpush1.bf16.msra.mxu0 %v3800_v48  ;;  %5018 = vst [vmem:[#allocation15_spill] sm:$0xff] %v4282_v43  ;;  %v95_v58 = vld [vmem:[#allocation3 + $0x118] sm:$0xff] }
  0xba   :  { %2576 = vmatpush1.bf16.msra.mxu1 %v3803_v54  ;;  %2464 = vmatprep.subr.bf16.mxu0 %v3808_v8  ;;  %v3820_v48 = vld [vmem:[#allocation5 + $0xc] ss:$16 sps:$4 sm:$0xff]   ;;  %v4284_v8 = vcombine.high %v94_v40, %v98_v41 }
  0xbb   :  { %2577 = vmatprep.subr.bf16.mxu1 %v3811_v9  ;;  %2290 = vmatprep.mubr.bf16.mxu0 %v4272_v26  ;;  %v3823_v54 = vld [vmem:[#allocation5 + $0x20c] ss:$16 sps:$4 sm:$0xff]   ;;  %v4286_v9 = vcombine.high %v95_v58, %v99_v57 }
  0xbc   :  { %2403 = vmatprep.mubr.bf16.mxu1 %v4274_v27  ;;  %5019 = vst [vmem:[#allocation16_spill] sm:$0xff] %v4284_v8  ;;  %v3829_v3 = vld [vmem:[#allocation5 + $0x3ec] ss:$16 sps:$4 sm:$0xff]   ;;  %v4292_v27 = vcombine.low %v94_v40, %v98_v41  ;;  %v3830_v40 = vld [vmem:[#allocation5 + $0x1c8] ss:$16 sps:$4 sm:$0xff]  }
  0xbd   :  { %2465 = vmatpush1.bf16.msra.mxu0 %v3806_v10  ;;  %5020 = vst [vmem:[#allocation17_spill] sm:$0xff] %v4286_v9  ;;  %v3824_v10 = vld [vmem:[#allocation5 + $0x1e8] ss:$16 sps:$4 sm:$0xff]  }
  0xbe   :  { %2578 = vmatpush1.bf16.msra.mxu1 %v3809_v13  ;;  %2466 = vmatprep.subr.bf16.mxu0 %v3814_v20  ;;  %v3827_v13 = vld [vmem:[#allocation5 + $0x3e8] ss:$16 sps:$4 sm:$0xff]   ;;  %v102_v20 = vld [vmem:[#allocation3 + $0x150] sm:$0xff]  ;;  %5021 = vst [vmem:[#allocation18_spill] sm:$0xff] %v4292_v27 }
  0xbf   :  { %2579 = vmatprep.subr.bf16.mxu1 %v3817_v21  ;;  %v106_v21 = vld [vmem:[#allocation3 + $0x170] sm:$0xff]  ;;  %v107_v26 = vld [vmem:[#allocation3 + $0x178] sm:$0xff] }
  0xc0   :  { %2291 = vmatmul.mubr.bf16.gmra.mxu0 %v4280_v42  ;;  %v4294_v42 = vcombine.low %v95_v58, %v99_v57  ;;  %v3833_v41 = vld [vmem:[#allocation5 + $0x3c8] ss:$16 sps:$4 sm:$0xff]   ;;  %v3838_v57 = vld [vmem:[#allocation5 + $0x1ac] ss:$16 sps:$4 sm:$0xff]  }
  0xc1   :  { %2404 = vmatmul.mubr.bf16.gmra.mxu1 %v4282_v43  ;;  %2467 = vmatpush1.bf16.msra.mxu0 %v3812_v30  ;;  %v103_v43 = vld [vmem:[#allocation3 + $0x158] sm:$0xff] }
  0xc2   :  { %2580 = vmatpush1.bf16.msra.mxu1 %v3815_v31  ;;  %2468 = vmatprep.subr.bf16.mxu0 %v3820_v48  ;;  %5022 = vst [vmem:[#allocation19_spill] sm:$0xff] %v4294_v42  ;;  %v3832_v30 = vld [vmem:[#allocation5 + $0x1cc] ss:$16 sps:$4 sm:$0xff]   ;;  %v4296_v48 = vcombine.high %v102_v20, %v106_v21 }
  0xc3   :  { %2581 = vmatprep.subr.bf16.mxu1 %v3823_v54  ;;  %2300 = vmatprep.mubr.bf16.mxu0 %v4284_v8  ;;  %v3835_v31 = vld [vmem:[#allocation5 + $0x3cc] ss:$16 sps:$4 sm:$0xff]   ;;  %v4298_v54 = vcombine.high %v103_v43, %v107_v26 }
  0xc4   :  { %2413 = vmatprep.mubr.bf16.mxu1 %v4286_v9  ;;  %5023 = vst [vmem:[#allocation20_spill] sm:$0xff] %v4296_v48  ;;  %v3841_v58 = vld [vmem:[#allocation5 + $0x3ac] ss:$16 sps:$4 sm:$0xff]   ;;  %v4304_v9 = vcombine.low %v102_v20, %v106_v21  ;;  %v3842_v20 = vld [vmem:[#allocation5 + $0x188] ss:$16 sps:$4 sm:$0xff]  }
  0xc5   :  { %2469 = vmatpush1.bf16.msra.mxu0 %v3818_v56  ;;  %5024 = vst [vmem:[#allocation21_spill] sm:$0xff] %v4298_v54  ;;  %v3836_v56 = vld [vmem:[#allocation5 + $0x1a8] ss:$16 sps:$4 sm:$0xff]  }
  0xc6   :  { %2582 = vmatpush1.bf16.msra.mxu1 %v3821_v59  ;;  %2470 = vmatprep.subr.bf16.mxu0 %v3826_v2  ;;  %v3839_v59 = vld [vmem:[#allocation5 + $0x3a8] ss:$16 sps:$4 sm:$0xff]   ;;  %v110_v2 = vld [vmem:[#allocation3 + $0x190] sm:$0xff]  ;;  %5025 = vst [vmem:[#allocation22_spill] sm:$0xff] %v4304_v9 }
  0xc7   :  { %2583 = vmatprep.subr.bf16.mxu1 %v3829_v3  ;;  %v114_v3 = vld [vmem:[#allocation3 + $0x1b0] sm:$0xff]  ;;  %v115_v8 = vld [vmem:[#allocation3 + $0x1b8] sm:$0xff] }
  0xc8   :  { %2301 = vmatmul.mubr.bf16.gmra.mxu0 %v4292_v27  ;;  %v4306_v27 = vcombine.low %v103_v43, %v107_v26  ;;  %v3845_v21 = vld [vmem:[#allocation5 + $0x388] ss:$16 sps:$4 sm:$0xff]   ;;  %v3850_v26 = vld [vmem:[#allocation5 + $0x16c] ss:$16 sps:$4 sm:$0xff]  }
  0xc9   :  { %2414 = vmatmul.mubr.bf16.gmra.mxu1 %v4294_v42  ;;  %2471 = vmatpush2.bf16.msra.mxu0 %v3824_v10  ;;  %v111_v42 = vld [vmem:[#allocation3 + $0x198] sm:$0xff] }
  0xca   :  { %2584 = vmatpush2.bf16.msra.mxu1 %v3827_v13  ;;  %2472 = vmatprep.subr.bf16.mxu0 %v3832_v30  ;;  %5026 = vst [vmem:[#allocation23_spill] sm:$0xff] %v4306_v27  ;;  %v3844_v10 = vld [vmem:[#allocation5 + $0x18c] ss:$16 sps:$4 sm:$0xff]   ;;  %v4308_v30 = vcombine.high %v110_v2, %v114_v3 }
  0xcb   :  { %2585 = vmatprep.subr.bf16.mxu1 %v3835_v31  ;;  %2310 = vmatprep.mubr.bf16.mxu0 %v4296_v48  ;;  %v3847_v13 = vld [vmem:[#allocation5 + $0x38c] ss:$16 sps:$4 sm:$0xff]   ;;  %v4310_v31 = vcombine.high %v111_v42, %v115_v8 }
  0xcc   :  { %2423 = vmatprep.mubr.bf16.mxu1 %v4298_v54  ;;  %v3853_v43 = vld [vmem:[#allocation5 + $0x36c] ss:$16 sps:$4 sm:$0xff]   ;;  %v4316_v54 = vcombine.low %v110_v2, %v114_v3  ;;  %v3854_v2 = vld [vmem:[#allocation5 + $0x148] ss:$16 sps:$4 sm:$0xff]  }
  0xcd   :  { %2473 = vmatpush2.bf16.msra.mxu0 %v3830_v40  ;;  %v3848_v40 = vld [vmem:[#allocation5 + $0x168] ss:$16 sps:$4 sm:$0xff]  }
  0xce   :  { %2586 = vmatpush2.bf16.msra.mxu1 %v3833_v41  ;;  %2474 = vmatprep.subr.bf16.mxu0 %v3838_v57  ;;  %v3851_v41 = vld [vmem:[#allocation5 + $0x368] ss:$16 sps:$4 sm:$0xff]   ;;  %v118_v57 = vld [vmem:[#allocation3 + $0x1d0] sm:$0xff] }
  0xcf   :  { %2587 = vmatprep.subr.bf16.mxu1 %v3841_v58  ;;  %v122_v58 = vld [vmem:[#allocation3 + $0x1f0] sm:$0xff]  ;;  %v123_v48 = vld [vmem:[#allocation3 + $0x1f8] sm:$0xff] }
  0xd0   :  { %2311 = vmatmul.mubr.bf16.gmra.mxu0 %v4304_v9  ;;  %v4318_v9 = vcombine.low %v111_v42, %v115_v8  ;;  %v3857_v3 = vld [vmem:[#allocation5 + $0x348] ss:$16 sps:$4 sm:$0xff]   ;;  %v3862_v42 = vld [vmem:[#allocation5 + $0x12c] ss:$16 sps:$4 sm:$0xff]  }
  0xd1   :  { %2424 = vmatmul.mubr.bf16.gmra.mxu1 %v4306_v27  ;;  %2475 = vmatpush2.bf16.msra.mxu0 %v3836_v56  ;;  %v119_v27 = vld [vmem:[#allocation3 + $0x1d8] sm:$0xff] }
  0xd2   :  { %2588 = vmatpush2.bf16.msra.mxu1 %v3839_v59  ;;  %2476 = vmatprep.subr.bf16.mxu0 %v3844_v10  ;;  %5027 = vst [vmem:[#allocation24_spill] sm:$0xff] %v4318_v9  ;;  %v3856_v56 = vld [vmem:[#allocation5 + $0x14c] ss:$16 sps:$4 sm:$0xff]   ;;  %v4320_v10 = vcombine.high %v118_v57, %v122_v58 }
  0xd3   :  { %2589 = vmatprep.subr.bf16.mxu1 %v3847_v13  ;;  %2320 = vmatprep.mubr.bf16.mxu0 %v4308_v30  ;;  %v3859_v59 = vld [vmem:[#allocation5 + $0x34c] ss:$16 sps:$4 sm:$0xff]   ;;  %v4322_v13 = vcombine.high %v119_v27, %v123_v48 }
  0xd4   :  { %2433 = vmatprep.mubr.bf16.mxu1 %v4310_v31  ;;  %v3865_v8 = vld [vmem:[#allocation5 + $0x32c] ss:$16 sps:$4 sm:$0xff]  }
  0xd5   :  { %2477 = vmatpush2.bf16.msra.mxu0 %v3842_v20  ;;  %v4328_v20 = vcombine.low %v118_v57, %v122_v58  ;;  %v3874_v57 = vld [vmem:[#allocation5 + $0x4ec] ss:$16 sps:$4 sm:$0xff]   ;;  %v3875_v58 = vld [vmem:[#allocation5 + $0x6e8] ss:$16 sps:$4 sm:$0xff]  }
  0xd6   :  { %2590 = vmatpush2.bf16.msra.mxu1 %v3845_v21  ;;  %2478 = vmatprep.subr.bf16.mxu0 %v3850_v26  ;;  %v4330_v21 = vcombine.low %v119_v27, %v123_v48  ;;  %v3860_v26 = vld [vmem:[#allocation5 + $0x128] ss:$16 sps:$4 sm:$0xff]   ;;  %v3877_v27 = vld [vmem:[#allocation5 + $0x6ec] ss:$16 sps:$4 sm:$0xff]  }
  0xd7   :  { %2591 = vmatprep.subr.bf16.mxu1 %v3853_v43  ;;  %v3863_v43 = vld [vmem:[#allocation5 + $0x328] ss:$16 sps:$4 sm:$0xff]  }
  0xd8   :  { %2321 = vmatmul.mubr.bf16.gmra.mxu0 %v4316_v54  ;;  %v3872_v48 = vld [vmem:[#allocation5 + $0x4e8] ss:$16 sps:$4 sm:$0xff]  }
  0xd9   :  { %2434 = vmatmul.mubr.bf16.gmra.mxu1 %v4318_v9  ;;  %2479 = vmatpush2.bf16.msra.mxu0 %v3848_v40  ;;  %v3868_v9 = vld [vmem:[#allocation5 + $0x10c] ss:$16 sps:$4 sm:$0xff]  }
  0xda   :  { %2592 = vmatpush2.bf16.msra.mxu1 %v3851_v41  ;;  %2480 = vmatprep.subr.bf16.mxu0 %v3856_v56  ;;  %v3871_v40 = vld [vmem:[#allocation5 + $0x30c] ss:$16 sps:$4 sm:$0xff]   ;;  %v3866_v41 = vld [vmem:[#allocation5 + $0x108] ss:$16 sps:$4 sm:$0xff]  }
  0xdb   :  { %2593 = vmatprep.subr.bf16.mxu1 %v3859_v59  ;;  %2330 = vmatprep.mubr.bf16.mxu0 %v4320_v10  ;;  %v3869_v56 = vld [vmem:[#allocation5 + $0x308] ss:$16 sps:$4 sm:$0xff]   ;;  %v3880_v59 = vld [vmem:[#allocation5 + $0x4cc] ss:$16 sps:$4 sm:$0xff]  }
  0xdc   :  { %2443 = vmatprep.mubr.bf16.mxu1 %v4322_v13 }
  0xdd   :  { %2481 = vmatpush2.bf16.msra.mxu0 %v3854_v2  ;;  %v3883_v2 = vld [vmem:[#allocation5 + $0x6cc] ss:$16 sps:$4 sm:$0xff]  }
  0xde   :  { %2594 = vmatpush2.bf16.msra.mxu1 %v3857_v3  ;;  %2482 = vmatprep.subr.bf16.mxu0 %v3862_v42  ;;  %v3881_v3 = vld [vmem:[#allocation5 + $0x6c8] ss:$16 sps:$4 sm:$0xff]  }
  0xdf   :  { %2595 = vmatprep.subr.bf16.mxu1 %v3865_v8  ;;  %v3884_v42 = vld [vmem:[#allocation5 + $0x4a8] ss:$16 sps:$4 sm:$0xff]  }
  0xe0   :  { %2331 = vmatmul.mubr.bf16.gmra.mxu0 %v4328_v20  ;;  %v3887_v8 = vld [vmem:[#allocation5 + $0x6a8] ss:$16 sps:$4 sm:$0xff]  }
  0xe1   :  { %2444 = vmatmul.mubr.bf16.gmra.mxu1 %v4330_v21  ;;  %2483 = vmatpush2.bf16.msra.mxu0 %v3860_v26  ;;  %v3890_v26 = vld [vmem:[#allocation5 + $0x488] ss:$16 sps:$4 sm:$0xff]  }
  0xe2   :  { %2596 = vmatpush2.bf16.msra.mxu1 %v3863_v43  ;;  %2484 = vmatprep.subr.bf16.mxu0 %v3868_v9  ;;  %v3878_v9 = vld [vmem:[#allocation5 + $0x4c8] ss:$16 sps:$4 sm:$0xff]  }
  0xe3   :  { %2597 = vmatprep.subr.bf16.mxu1 %v3871_v40  ;;  %2486 = vmatprep.mubr.bf16.mxu0 %v4142_v53  ;;  %v3886_v53 = vld [vmem:[#allocation5 + $0x4ac] ss:$16 sps:$4 sm:$0xff]   ;;  %v3893_v43 = vld [vmem:[#allocation5 + $0x688] ss:$16 sps:$4 sm:$0xff]  }
  0xe4   :  { %2599 = vmatprep.mubr.bf16.mxu1 %v4144_v55  ;;  %v3889_v55 = vld [vmem:[#allocation5 + $0x6ac] ss:$16 sps:$4 sm:$0xff]   ;;  %v3896_v40 = vld [vmem:[#allocation5 + $0x468] ss:$16 sps:$4 sm:$0xff]  }
  0xe5   :  { %2485 = vmatpush2.bf16.msra.mxu0 %v3866_v41  ;;  %v3899_v41 = vld [vmem:[#allocation5 + $0x668] ss:$16 sps:$4 sm:$0xff]  }
  0xe6   :  { %2598 = vmatpush2.bf16.msra.mxu1 %v3869_v56  ;;  %2680 = vmatprep.subr.bf16.mxu0 %v3874_v57  ;;  %v3902_v56 = vld [vmem:[#allocation5 + $0x448] ss:$16 sps:$4 sm:$0xff]  }
  0xe7   :  { %2793 = vmatprep.subr.bf16.mxu1 %v3877_v27  ;;  %v3905_v57 = vld [vmem:[#allocation5 + $0x648] ss:$16 sps:$4 sm:$0xff]  }
  0xe8   :  { %2487 = vmatmul.mubr.bf16.vlgmr.msra.gmra.mxu0 %v4148_v11  ;;  %v3892_v11 = vld [vmem:[#allocation5 + $0x48c] ss:$16 sps:$4 sm:$0xff]   ;;  %v3908_v27 = vld [vmem:[#allocation5 + $0x428] ss:$16 sps:$4 sm:$0xff]  }
  0xe9   :  { %2600 = vmatmul.mubr.bf16.vlgmr.msra.gmra.mxu1 %v4150_v12  ;;  %2681 = vmatpush1.bf16.msra.mxu0 %v3872_v48  ;;  %v3895_v12 = vld [vmem:[#allocation5 + $0x68c] ss:$16 sps:$4 sm:$0xff]   ;;  %v3911_v48 = vld [vmem:[#allocation5 + $0x628] ss:$16 sps:$4 sm:$0xff]  }
  0xea   :  { %2794 = vmatpush1.bf16.msra.mxu1 %v3875_v58  ;;  %2682 = vmatprep.subr.bf16.mxu0 %v3880_v59  ;;  %v3914_v58 = vld [vmem:[#allocation5 + $0x408] ss:$16 sps:$4 sm:$0xff]  }
  0xeb   :  { %2795 = vmatprep.subr.bf16.mxu1 %v3883_v2  ;;  %2496 = vmatprep.mubr.bf16.mxu0 %v4152_v18  ;;  %v3898_v18 = vld [vmem:[#allocation5 + $0x46c] ss:$16 sps:$4 sm:$0xff]   ;;  %v3917_v59 = vld [vmem:[#allocation5 + $0x608] ss:$16 sps:$4 sm:$0xff]  }
  0xec   :  { %2609 = vmatprep.mubr.bf16.mxu1 %v4154_v19  ;;  %v3901_v19 = vld [vmem:[#allocation5 + $0x66c] ss:$16 sps:$4 sm:$0xff]   ;;  %v3920_v2 = vld [vmem:[#allocation5 + $0x5e8] ss:$16 sps:$4 sm:$0xff]  }
  0xed   :  { %2683 = vmatpush1.bf16.msra.mxu0 %v3878_v9  ;;  %v3923_v9 = vld [vmem:[#allocation5 + $0x7e8] ss:$16 sps:$4 sm:$0xff]  }
  0xee   :  { %2796 = vmatpush1.bf16.msra.mxu1 %v3881_v3  ;;  %2684 = vmatprep.subr.bf16.mxu0 %v3886_v53  ;;  %v3926_v3 = vld [vmem:[#allocation5 + $0x5c8] ss:$16 sps:$4 sm:$0xff]  }
  0xef   :  { %2797 = vmatprep.subr.bf16.mxu1 %v3889_v55  ;;  %v3929_v53 = vld [vmem:[#allocation5 + $0x7c8] ss:$16 sps:$4 sm:$0xff]  }
  0xf0   :  { %2497 = vmatmul.mubr.bf16.gmra.mxu0 %v4160_v28  ;;  %v3904_v28 = vld [vmem:[#allocation5 + $0x44c] ss:$16 sps:$4 sm:$0xff]   ;;  %v3932_v55 = vld [vmem:[#allocation5 + $0x5a8] ss:$16 sps:$4 sm:$0xff]  }
  0xf1   :  { %2610 = vmatmul.mubr.bf16.gmra.mxu1 %v4162_v29  ;;  %2685 = vmatpush1.bf16.msra.mxu0 %v3884_v42  ;;  %v3907_v29 = vld [vmem:[#allocation5 + $0x64c] ss:$16 sps:$4 sm:$0xff]   ;;  %v3935_v42 = vld [vmem:[#allocation5 + $0x7a8] ss:$16 sps:$4 sm:$0xff]  }
  0xf2   :  { %2798 = vmatpush1.bf16.msra.mxu1 %v3887_v8  ;;  %2686 = vmatprep.subr.bf16.mxu0 %v3892_v11  ;;  %v3938_v8 = vld [vmem:[#allocation5 + $0x588] ss:$16 sps:$4 sm:$0xff]  }
  0xf3   :  { %2799 = vmatprep.subr.bf16.mxu1 %v3895_v12  ;;  %2506 = vmatprep.mubr.bf16.mxu0 %v4164_v34  ;;  %v3910_v34 = vld [vmem:[#allocation5 + $0x42c] ss:$16 sps:$4 sm:$0xff]   ;;  %v3941_v11 = vld [vmem:[#allocation5 + $0x788] ss:$16 sps:$4 sm:$0xff]  }
  0xf4   :  { %2619 = vmatprep.mubr.bf16.mxu1 %v4166_v35  ;;  %v3913_v35 = vld [vmem:[#allocation5 + $0x62c] ss:$16 sps:$4 sm:$0xff]   ;;  %v3944_v12 = vld [vmem:[#allocation5 + $0x568] ss:$16 sps:$4 sm:$0xff]  }
  0xf5   :  { %2687 = vmatpush1.bf16.msra.mxu0 %v3890_v26  ;;  %v3947_v26 = vld [vmem:[#allocation5 + $0x768] ss:$16 sps:$4 sm:$0xff]  }
  0xf6   :  { %2800 = vmatpush1.bf16.msra.mxu1 %v3893_v43  ;;  %2688 = vmatprep.subr.bf16.mxu0 %v3898_v18  ;;  %v3950_v43 = vld [vmem:[#allocation5 + $0x548] ss:$16 sps:$4 sm:$0xff]  }
  0xf7   :  { %2801 = vmatprep.subr.bf16.mxu1 %v3901_v19  ;;  %v3953_v18 = vld [vmem:[#allocation5 + $0x748] ss:$16 sps:$4 sm:$0xff]   ;;  %v382_v19 = vlaneseq }
  0xf8   :  { %2507 = vmatmul.mubr.bf16.gmra.mxu0 %v4172_v44  ;;  %v3916_v44 = vld [vmem:[#allocation5 + $0x40c] ss:$16 sps:$4 sm:$0xff]  }
  0xf9   :  { %2620 = vmatmul.mubr.bf16.gmra.mxu1 %v4174_v45  ;;  %2689 = vmatpush1.bf16.msra.mxu0 %v3896_v40  ;;  %v3919_v45 = vld [vmem:[#allocation5 + $0x60c] ss:$16 sps:$4 sm:$0xff]   ;;  %v3956_v40 = vld [vmem:[#allocation5 + $0x528] ss:$16 sps:$4 sm:$0xff]  }
  0xfa   :  { %2802 = vmatpush1.bf16.msra.mxu1 %v3899_v41  ;;  %2690 = vmatprep.subr.bf16.mxu0 %v3904_v28  ;;  %v3959_v41 = vld [vmem:[#allocation5 + $0x728] ss:$16 sps:$4 sm:$0xff]   ;;  %v3967_v28 = vld [vmem:[#allocation5 + $0x70c] ss:$16 sps:$4 sm:$0xff]  }
  0xfb   :  { %2803 = vmatprep.subr.bf16.mxu1 %v3907_v29  ;;  %2516 = vmatprep.mubr.bf16.mxu0 %v4176_v50  ;;  %v3922_v50 = vld [vmem:[#allocation5 + $0x5ec] ss:$16 sps:$4 sm:$0xff]   ;;  %v3962_v29 = vld [vmem:[#allocation5 + $0x508] ss:$16 sps:$4 sm:$0xff]  }
  0xfc   :  { %2629 = vmatprep.mubr.bf16.mxu1 %v4178_v51  ;;  %v3925_v51 = vld [vmem:[#allocation5 + $0x7ec] ss:$16 sps:$4 sm:$0xff]  }
  0xfd   :  { %2691 = vmatpush1.bf16.msra.mxu0 %v3902_v56  ;;  %v4372_v56 = vld [vmem:[%s4994_s2] sm:$0xf] }
  0xfe   :  { %2804 = vmatpush1.bf16.msra.mxu1 %v3905_v57  ;;  %2692 = vmatprep.subr.bf16.mxu0 %v3910_v34 }
  0xff   :  { %2805 = vmatprep.subr.bf16.mxu1 %v3913_v35 }
 0x100   :  { %2517 = vmatmul.mubr.bf16.gmra.mxu0 %v4184_v61  ;;  %v3928_v61 = vld [vmem:[#allocation5 + $0x5cc] ss:$16 sps:$4 sm:$0xff]  }
 0x101   :  { %2630 = vmatmul.mubr.bf16.gmra.mxu1 %v4186_v62  ;;  %2693 = vmatpush1.bf16.msra.mxu0 %v3908_v27  ;;  %v3931_v62 = vld [vmem:[#allocation5 + $0x7cc] ss:$16 sps:$4 sm:$0xff]  }
 0x102   :  { %2806 = vmatpush1.bf16.msra.mxu1 %v3911_v48  ;;  %2694 = vmatprep.subr.bf16.mxu0 %v3916_v44 }
 0x103   :  { %2807 = vmatprep.subr.bf16.mxu1 %v3919_v45  ;;  %2526 = vmatprep.mubr.bf16.mxu0 %v4188_v4  ;;  %v3934_v4 = vld [vmem:[#allocation5 + $0x5ac] ss:$16 sps:$4 sm:$0xff]  }
 0x104   :  { %2639 = vmatprep.mubr.bf16.mxu1 %v4190_v5  ;;  %v3937_v5 = vld [vmem:[#allocation5 + $0x7ac] ss:$16 sps:$4 sm:$0xff]  }
 0x105   :  { %2695 = vmatpush1.bf16.msra.mxu0 %v3914_v58 }
 0x106   :  { %2808 = vmatpush1.bf16.msra.mxu1 %v3917_v59  ;;  %2696 = vmatprep.subr.bf16.mxu0 %v3922_v50 }
 0x107   :  { %2809 = vmatprep.subr.bf16.mxu1 %v3925_v51 }
 0x108   :  { %2527 = vmatmul.mubr.bf16.gmra.mxu0 %v4196_v14  ;;  %v3940_v14 = vld [vmem:[#allocation5 + $0x58c] ss:$16 sps:$4 sm:$0xff]  }
 0x109   :  { %2640 = vmatmul.mubr.bf16.gmra.mxu1 %v4198_v15  ;;  %2697 = vmatpush2.bf16.msra.mxu0 %v3920_v2  ;;  %v3943_v15 = vld [vmem:[#allocation5 + $0x78c] ss:$16 sps:$4 sm:$0xff]  }
 0x10a   :  { %2810 = vmatpush2.bf16.msra.mxu1 %v3923_v9  ;;  %2698 = vmatprep.subr.bf16.mxu0 %v3928_v61 }
 0x10b   :  { %2811 = vmatprep.subr.bf16.mxu1 %v3931_v62  ;;  %2536 = vmatprep.mubr.bf16.mxu0 %v4200_v24  ;;  %v3946_v24 = vld [vmem:[#allocation5 + $0x56c] ss:$16 sps:$4 sm:$0xff]  }
 0x10c   :  { %2649 = vmatprep.mubr.bf16.mxu1 %v4202_v25  ;;  %v3949_v25 = vld [vmem:[#allocation5 + $0x76c] ss:$16 sps:$4 sm:$0xff]  }
 0x10d   :  { %2699 = vmatpush2.bf16.msra.mxu0 %v3926_v3 }
 0x10e   :  { %2812 = vmatpush2.bf16.msra.mxu1 %v3929_v53  ;;  %2700 = vmatprep.subr.bf16.mxu0 %v3934_v4 }
 0x10f   :  { %2813 = vmatprep.subr.bf16.mxu1 %v3937_v5 }
 0x110   :  { %2537 = vmatmul.mubr.bf16.gmra.mxu0 %v4208_v37  ;;  %v3952_v37 = vld [vmem:[#allocation5 + $0x54c] ss:$16 sps:$4 sm:$0xff]  }
 0x111   :  { %2650 = vmatmul.mubr.bf16.gmra.mxu1 %v4210_v38  ;;  %2701 = vmatpush2.bf16.msra.mxu0 %v3932_v55  ;;  %v3955_v38 = vld [vmem:[#allocation5 + $0x74c] ss:$16 sps:$4 sm:$0xff]  }
 0x112   :  { %2814 = vmatpush2.bf16.msra.mxu1 %v3935_v42  ;;  %2702 = vmatprep.subr.bf16.mxu0 %v3940_v14 }
 0x113   :  { %2815 = vmatprep.subr.bf16.mxu1 %v3943_v15  ;;  %2546 = vmatprep.mubr.bf16.mxu0 %v4212_v46  ;;  %v3958_v46 = vld [vmem:[#allocation5 + $0x52c] ss:$16 sps:$4 sm:$0xff]  }
 0x114   :  { %2659 = vmatprep.mubr.bf16.mxu1 %v4214_v47  ;;  %v3961_v47 = vld [vmem:[#allocation5 + $0x72c] ss:$16 sps:$4 sm:$0xff]  }
 0x115   :  { %2703 = vmatpush2.bf16.msra.mxu0 %v3938_v8 }
 0x116   :  { %2816 = vmatpush2.bf16.msra.mxu1 %v3941_v11  ;;  %2704 = vmatprep.subr.bf16.mxu0 %v3946_v24  ;;  %v5028_v11 = vld [vmem:[#allocation10_spill] sm:$0xff]  ;;  %v5029_v24 = vld [vmem:[#allocation11_spill] sm:$0xff] }
 0x117   :  { %2817 = vmatprep.subr.bf16.mxu1 %v3949_v25 }
 0x118   :  { %2547 = vmatmul.mubr.bf16.gmra.mxu0 %v4220_v60  ;;  %v4364_v60 = vshrl.u32 %v382_v19, 7 }
 0x119   :  { %2660 = vmatmul.mubr.bf16.gmra.mxu1 %v4222_v63  ;;  %2705 = vmatpush2.bf16.msra.mxu0 %v3944_v12  ;;  %v3964_v63 = vld [vmem:[#allocation5 + $0x50c] ss:$16 sps:$4 sm:$0xff]  }
 0x11a   :  { %2818 = vmatpush2.bf16.msra.mxu1 %v3947_v26  ;;  %2706 = vmatprep.subr.bf16.mxu0 %v3952_v37  ;;  %v5030_v26 = vld [vmem:[#allocation12_spill] sm:$0xff]  ;;  %v5031_v37 = vld [vmem:[#allocation13_spill] sm:$0xff] }
 0x11b   :  { %2819 = vmatprep.subr.bf16.mxu1 %v3955_v38  ;;  %2556 = vmatprep.mubr.bf16.mxu0 %v4224_v6  ;;  %v3965_v6 = vld [vmem:[#allocation5 + $0x708] ss:$16 sps:$4 sm:$0xff]  }
 0x11c   :  { %2669 = vmatprep.mubr.bf16.mxu1 %v4226_v7  ;;  %v384_v7 = vsub.s32 0, %v4364_v60 }
 0x11d   :  { %2707 = vmatpush2.bf16.msra.mxu0 %v3950_v43 }
 0x11e   :  { %2820 = vmatpush2.bf16.msra.mxu1 %v3953_v18  ;;  %2708 = vmatprep.subr.bf16.mxu0 %v3958_v46 }
 0x11f   :  { %2821 = vmatprep.subr.bf16.mxu1 %v3961_v47 }
 0x120   :  { %2557 = vmatmul.mubr.bf16.gmra.mxu0 %v4232_v22  ;;  %v388_v22 = vsub.s32 1, %v4364_v60 }
 0x121   :  { %2670 = vmatmul.mubr.bf16.gmra.mxu1 %v4234_v23  ;;  %2709 = vmatpush2.bf16.msra.mxu0 %v3956_v40  ;;  %v4380_v23 = vrot.slane %v4372_v56, %v384_v7 }
 0x122   :  { %2822 = vmatpush2.bf16.msra.mxu1 %v3959_v41  ;;  %2710 = vmatprep.subr.bf16.mxu0 %v3964_v63  ;;  %v4385_v57 = vrot.slane %v4372_v56, %v388_v22 }
 0x123   :  { %2823 = vmatprep.subr.bf16.mxu1 %v3967_v28  ;;  %2712 = vmatprep.mubr.bf16.mxu0 %v4236_v32 }
 0x124   :  { %2825 = vmatprep.mubr.bf16.mxu1 %v4238_v33 }
 0x125   :  { %2711 = vmatpush2.bf16.msra.mxu0 %v3962_v29 }
 0x126   :  { %2824 = vmatpush2.bf16.msra.mxu1 %v3965_v6 }
 0x128   :  { %v2036_v34 = vpop.f32.mrf.mxu0  ;;  %2713 = vmatmul.mubr.bf16.vlgmr.msra.gmra.mxu0 %v4244_v49 }
 0x129   :  { %v2149_v35 = vpop.f32.mrf.mxu1  ;;  %2826 = vmatmul.mubr.bf16.vlgmr.msra.gmra.mxu1 %v4246_v52  ;;  %v2037_v32 = vadd.f32 %v2036_v34, %v4380_v23  ;;  %2722 = vmatprep.mubr.bf16.mxu0 %v4248_v0 }
 0x12a   :  { %2835 = vmatprep.mubr.bf16.mxu1 %v4250_v1  ;;  %v2038_v33 = vpop.f32.mrf.mxu0 }
 0x12b   :  { %v2151_v27 = vpop.f32.mrf.mxu1  ;;  %v4392_v48 = vadd.f32 %v2149_v35, %v2037_v32  ;;  %v2039_v44 = vadd.f32 %v2038_v33, %v4385_v57  ;;  %v5032_v32 = vld [vmem:[#allocation14_spill] sm:$0xff]  ;;  %v5033_v33 = vld [vmem:[#allocation15_spill] sm:$0xff] }
 0x12c   :  { %v2040_v45 = vpop.f32.mrf.mxu0 }
 0x12d   :  { %v2153_v58 = vpop.f32.mrf.mxu1  ;;  %v4395_v59 = vadd.f32 %v2151_v27, %v2039_v44  ;;  %v2041_v49 = vadd.f32 %v2040_v45, %v4380_v23  ;;  %v5034_v45 = vld [vmem:[#allocation16_spill] sm:$0xff] }
 0x12e   :  { %v2042_v50 = vpop.f32.mrf.mxu0 }
 0x12f   :  { %v2155_v52 = vpop.f32.mrf.mxu1  ;;  %v4398_v51 = vadd.f32 %v2153_v58, %v2041_v49  ;;  %v2043_v0 = vadd.f32 %v2042_v50, %v4385_v57  ;;  %v5035_v58 = vld [vmem:[#allocation17_spill] sm:$0xff] }
 0x130   :  { %v2046_v2 = vpop.f32.mrf.mxu0  ;;  %2723 = vmatmul.mubr.bf16.gmra.mxu0 %v4256_v16 }
 0x131   :  { %v2159_v1 = vpop.f32.mrf.mxu1  ;;  %2836 = vmatmul.mubr.bf16.gmra.mxu1 %v4258_v17  ;;  %v4403_v9 = vadd.f32 %v2155_v52, %v2043_v0  ;;  %v2047_v61 = vadd.f32 %v2046_v2, %v4380_v23  ;;  %2732 = vmatprep.mubr.bf16.mxu0 %v4260_v36 }
 0x132   :  { %2845 = vmatprep.mubr.bf16.mxu1 %v4262_v39  ;;  %v2048_v62 = vpop.f32.mrf.mxu0 }
 0x133   :  { %v2161_v3 = vpop.f32.mrf.mxu1  ;;  %v4408_v53 = vadd.f32 %v2159_v1, %v2047_v61  ;;  %v2049_v4 = vadd.f32 %v2048_v62, %v4385_v57 }
 0x134   :  { %v2050_v5 = vpop.f32.mrf.mxu0 }
 0x135   :  { %v2163_v55 = vpop.f32.mrf.mxu1  ;;  %v4411_v42 = vadd.f32 %v2161_v3, %v2049_v4  ;;  %v2051_v16 = vadd.f32 %v2050_v5, %v4380_v23 }
 0x136   :  { %v2052_v17 = vpop.f32.mrf.mxu0 }
 0x137   :  { %v2165_v14 = vpop.f32.mrf.mxu1  ;;  %v4414_v15 = vadd.f32 %v2163_v55, %v2051_v16  ;;  %v2053_v36 = vadd.f32 %v2052_v17, %v4385_v57 }
 0x138   :  { %v2056_v8 = vpop.f32.mrf.mxu0  ;;  %2733 = vmatmul.mubr.bf16.gmra.mxu0 %v5028_v11  ;;  %v5038_v11 = vld [vmem:[#allocation20_spill] sm:$0xff] }
 0x139   :  { %v2169_v39 = vpop.f32.mrf.mxu1  ;;  %2846 = vmatmul.mubr.bf16.gmra.mxu1 %v5029_v24  ;;  %v4419_v25 = vadd.f32 %v2165_v14, %v2053_v36  ;;  %v2057_v12 = vadd.f32 %v2056_v8, %v4380_v23  ;;  %2742 = vmatprep.mubr.bf16.mxu0 %v5030_v26  ;;  %v5036_v14 = vld [vmem:[#allocation18_spill] sm:$0xff]  ;;  %v5037_v36 = vld [vmem:[#allocation19_spill] sm:$0xff]  ;;  %v5039_v24 = vld [vmem:[#allocation21_spill] sm:$0xff] }
 0x13a   :  { %2855 = vmatprep.mubr.bf16.mxu1 %v5031_v37  ;;  %v2058_v38 = vpop.f32.mrf.mxu0 }
 0x13b   :  { %v2171_v43 = vpop.f32.mrf.mxu1  ;;  %v4424_v18 = vadd.f32 %v2169_v39, %v2057_v12  ;;  %v2059_v19 = vadd.f32 %v2058_v38, %v4385_v57 }
 0x13c   :  { %v2060_v46 = vpop.f32.mrf.mxu0 }
 0x13d   :  { %v2173_v47 = vpop.f32.mrf.mxu1  ;;  %v4427_v40 = vadd.f32 %v2171_v43, %v2059_v19  ;;  %v2061_v41 = vadd.f32 %v2060_v46, %v4380_v23 }
 0x13e   :  { %v2062_v63 = vpop.f32.mrf.mxu0 }
 0x13f   :  { %v2175_v28 = vpop.f32.mrf.mxu1  ;;  %v4430_v29 = vadd.f32 %v2173_v47, %v2061_v41  ;;  %v2063_v6 = vadd.f32 %v2062_v63, %v4385_v57 }
 0x140   :  { %v2066_v34 = vpop.f32.mrf.mxu0  ;;  %2743 = vmatmul.mubr.bf16.gmra.mxu0 %v5032_v32  ;;  %v5040_v32 = vld [vmem:[#allocation22_spill] sm:$0xff] }
 0x141   :  { %v2179_v35 = vpop.f32.mrf.mxu1  ;;  %2856 = vmatmul.mubr.bf16.gmra.mxu1 %v5033_v33  ;;  %v4435_v27 = vadd.f32 %v2175_v28, %v2063_v6  ;;  %v2067_v44 = vadd.f32 %v2066_v34, %v4380_v23  ;;  %2752 = vmatprep.mubr.bf16.mxu0 %v5034_v45  ;;  %v5041_v33 = vld [vmem:[#allocation23_spill] sm:$0xff] }
 0x142   :  { %2865 = vmatprep.mubr.bf16.mxu1 %v5035_v58  ;;  %v2068_v49 = vpop.f32.mrf.mxu0 }
 0x143   :  { %v2181_v50 = vpop.f32.mrf.mxu1  ;;  %v4440_v52 = vadd.f32 %v2179_v35, %v2067_v44  ;;  %v2069_v0 = vadd.f32 %v2068_v49, %v4385_v57 }
 0x144   :  { %v2070_v2 = vpop.f32.mrf.mxu0 }
 0x145   :  { %v2183_v1 = vpop.f32.mrf.mxu1  ;;  %v4443_v61 = vadd.f32 %v2181_v50, %v2069_v0  ;;  %v2071_v62 = vadd.f32 %v2070_v2, %v4380_v23 }
 0x146   :  { %v2072_v3 = vpop.f32.mrf.mxu0 }
 0x147   :  { %v2185_v4 = vpop.f32.mrf.mxu1  ;;  %v4446_v5 = vadd.f32 %v2183_v1, %v2071_v62  ;;  %v2073_v55 = vadd.f32 %v2072_v3, %v4385_v57 }
 0x148   :  { %v2076_v16 = vpop.f32.mrf.mxu0  ;;  %2753 = vmatmul.mubr.bf16.gmra.mxu0 %v5036_v14  ;;  %v5042_v14 = vld [vmem:[#allocation24_spill] sm:$0xff] }
 0x149   :  { %v2189_v17 = vpop.f32.mrf.mxu1  ;;  %2866 = vmatmul.mubr.bf16.gmra.mxu1 %v5037_v36  ;;  %v4451_v8 = vadd.f32 %v2185_v4, %v2073_v55  ;;  %v2077_v39 = vadd.f32 %v2076_v16, %v4380_v23  ;;  %2762 = vmatprep.mubr.bf16.mxu0 %v5038_v11 }
 0x14a   :  { %2875 = vmatprep.mubr.bf16.mxu1 %v5039_v24  ;;  %v2078_v12 = vpop.f32.mrf.mxu0 }
 0x14b   :  { %v2191_v26 = vpop.f32.mrf.mxu1  ;;  %v4456_v37 = vadd.f32 %v2189_v17, %v2077_v39  ;;  %v2079_v38 = vadd.f32 %v2078_v12, %v4385_v57 }
 0x14c   :  { %v2080_v43 = vpop.f32.mrf.mxu0 }
 0x14d   :  { %v2193_v19 = vpop.f32.mrf.mxu1  ;;  %v4459_v46 = vadd.f32 %v2191_v26, %v2079_v38  ;;  %v2081_v47 = vadd.f32 %v2080_v43, %v4380_v23 }
 0x14e   :  { %v2082_v41 = vpop.f32.mrf.mxu0 }
 0x14f   :  { %v2195_v63 = vpop.f32.mrf.mxu1  ;;  %v4462_v28 = vadd.f32 %v2193_v19, %v2081_v47  ;;  %v2083_v6 = vadd.f32 %v2082_v41, %v4385_v57 }
 0x150   :  { %v2086_v34 = vpop.f32.mrf.mxu0  ;;  %2763 = vmatmul.mubr.bf16.gmra.mxu0 %v5040_v32 }
 0x151   :  { %v2199_v35 = vpop.f32.mrf.mxu1  ;;  %2876 = vmatmul.mubr.bf16.gmra.mxu1 %v5041_v33  ;;  %v4467_v44 = vadd.f32 %v2195_v63, %v2083_v6  ;;  %v2087_v45 = vadd.f32 %v2086_v34, %v4380_v23  ;;  %2772 = vmatprep.mubr.bf16.mxu0 %v4308_v30 }
 0x152   :  { %2885 = vmatprep.mubr.bf16.mxu1 %v4310_v31  ;;  %v2088_v58 = vpop.f32.mrf.mxu0 }
 0x153   :  { %v2201_v49 = vpop.f32.mrf.mxu1  ;;  %v4472_v50 = vadd.f32 %v2199_v35, %v2087_v45  ;;  %v2089_v0 = vadd.f32 %v2088_v58, %v4385_v57 }
 0x154   :  { %v2090_v2 = vpop.f32.mrf.mxu0 }
 0x155   :  { %v2203_v1 = vpop.f32.mrf.mxu1  ;;  %v4475_v62 = vadd.f32 %v2201_v49, %v2089_v0  ;;  %v2091_v3 = vadd.f32 %v2090_v2, %v4380_v23 }
 0x156   :  { %v2092_v4 = vpop.f32.mrf.mxu0 }
 0x157   :  { %v2205_v55 = vpop.f32.mrf.mxu1  ;;  %v4478_v16 = vadd.f32 %v2203_v1, %v2091_v3  ;;  %v2093_v30 = vadd.f32 %v2092_v4, %v4385_v57 }
 0x158   :  { %v2096_v17 = vpop.f32.mrf.mxu0  ;;  %2773 = vmatmul.mubr.bf16.gmra.mxu0 %v4316_v54 }
 0x159   :  { %v2209_v31 = vpop.f32.mrf.mxu1  ;;  %2886 = vmatmul.mubr.bf16.gmra.mxu1 %v5042_v14  ;;  %v4483_v36 = vadd.f32 %v2205_v55, %v2093_v30  ;;  %v2097_v39 = vadd.f32 %v2096_v17, %v4380_v23  ;;  %2782 = vmatprep.mubr.bf16.mxu0 %v4320_v10 }
 0x15a   :  { %2895 = vmatprep.mubr.bf16.mxu1 %v4322_v13  ;;  %v2098_v11 = vpop.f32.mrf.mxu0 }
 0x15b   :  { %v2211_v24 = vpop.f32.mrf.mxu1  ;;  %v4488_v12 = vadd.f32 %v2209_v31, %v2097_v39  ;;  %v2099_v26 = vadd.f32 %v2098_v11, %v4385_v57 }
 0x15c   :  { %v2100_v38 = vpop.f32.mrf.mxu0 }
 0x15d   :  { %v2213_v43 = vpop.f32.mrf.mxu1  ;;  %v4491_v19 = vadd.f32 %v2211_v24, %v2099_v26  ;;  %v2101_v54 = vadd.f32 %v2100_v38, %v4380_v23  ;;  %v4514_v24 = vld [vmem:[#allocation7] sm:$0xf] }
 0x15e   :  { %v2102_v47 = vpop.f32.mrf.mxu0 }
 0x15f   :  { %v2215_v41 = vpop.f32.mrf.mxu1  ;;  %v4494_v63 = vadd.f32 %v2213_v43, %v2101_v54  ;;  %v2103_v10 = vadd.f32 %v2102_v47, %v4385_v57 }
 0x160   :  { %v2106_v6 = vpop.f32.mrf.mxu0  ;;  %2783 = vmatmul.mubr.bf16.gmra.mxu0 %v4328_v20 }
 0x161   :  { %v2219_v13 = vpop.f32.mrf.mxu1  ;;  %2896 = vmatmul.mubr.bf16.gmra.mxu1 %v4330_v21  ;;  %v4499_v34 = vadd.f32 %v2215_v41, %v2103_v10  ;;  %v2107_v35 = vadd.f32 %v2106_v6, %v4380_v23 }
 0x162   :  { %v2108_v32 = vpop.f32.mrf.mxu0 }
 0x163   :  { %v2221_v33 = vpop.f32.mrf.mxu1  ;;  %v4502_v45 = vadd.f32 %v2219_v13, %v2107_v35  ;;  %v2109_v58 = vadd.f32 %v2108_v32, %v4385_v57 }
 0x164   :  { %v2110_v49 = vpop.f32.mrf.mxu0 }
 0x165   :  { %v2223_v0 = vpop.f32.mrf.mxu1  ;;  %v4505_v2 = vadd.f32 %v2221_v33, %v2109_v58  ;;  %v2111_v1 = vadd.f32 %v2110_v49, %v4380_v23 }
 0x166   :  { %v2112_v3 = vpop.f32.mrf.mxu0 }
 0x167   :  { %v2225_v20 = vpop.f32.mrf.mxu1  ;;  %v4508_v4 = vadd.f32 %v2223_v0, %v2111_v1  ;;  %v2113_v21 = vadd.f32 %v2112_v3, %v4385_v57  ;;  %v4520_v57 = vrot.slane %v4514_v24, %v388_v22 }
 0x168   :  { %v2262_v55 = vpop.f32.mrf.mxu0 }
 0x169   :  { %v2375_v30 = vpop.f32.mrf.mxu1  ;;  %v4511_v17 = vadd.f32 %v2225_v20, %v2113_v21  ;;  %v2263_v31 = vadd.f32 %v2262_v55, %v4392_v48  ;;  %v4526_v48 = vrot.slane %v4514_v24, %v384_v7 }
 0x16a   :  { %v2264_v14 = vpop.f32.mrf.mxu0 }
 0x16b   :  { %v2377_v39 = vpop.f32.mrf.mxu1  ;;  %v2376_v11 = vadd.f32 %v2375_v30, %v2263_v31  ;;  %v2265_v26 = vadd.f32 %v2264_v14, %v4395_v59 }
 0x16c   :  { %v2266_v23 = vpop.f32.mrf.mxu0 }
 0x16d   :  { %v2379_v38 = vpop.f32.mrf.mxu1  ;;  %v2378_v43 = vadd.f32 %v2377_v39, %v2265_v26  ;;  %v2267_v54 = vadd.f32 %v2266_v23, %v4398_v51  ;;  %v2906_v47 = vmax.f32 %v2376_v11, 0.0 }
 0x16e   :  { %v2268_v41 = vpop.f32.mrf.mxu0 }
 0x16f   :  { %v2381_v10 = vpop.f32.mrf.mxu1  ;;  %v2907_v6 = vmax.f32 %v2378_v43, 0.0  ;;  %v2380_v59 = vadd.f32 %v2379_v38, %v2267_v54  ;;  %v2269_v13 = vadd.f32 %v2268_v41, %v4403_v9  ;;  %v2992_v49 = vmul.f32 %v4526_v48, %v2906_v47 }
 0x170   :  { %v2272_v35 = vpop.f32.mrf.mxu0 }
 0x171   :  { %v2385_v32 = vpop.f32.mrf.mxu1  ;;  %v2993_v33 = vmul.f32 %v4520_v57, %v2907_v6  ;;  %v2910_v22 = vmax.f32 %v2380_v59, 0.0  ;;  %v2382_v58 = vadd.f32 %v2381_v10, %v2269_v13  ;;  %v2273_v51 = vadd.f32 %v2272_v35, %v4408_v53 }
 0x172   :  { %v2274_v0 = vpop.f32.mrf.mxu0 }
 0x173   :  { %v2387_v1 = vpop.f32.mrf.mxu1  ;;  %v2911_v7 = vmax.f32 %v2382_v58, 0.0  ;;  %v2386_v3 = vadd.f32 %v2385_v32, %v2273_v51  ;;  %v2275_v20 = vadd.f32 %v2274_v0, %v4411_v42  ;;  %v2996_v21 = vmul.f32 %v4526_v48, %v2910_v22 }
 0x174   :  { %v2276_v55 = vpop.f32.mrf.mxu0  ;;  %v4534_v30 = vadd.f32 %v2993_v33, %v2992_v49 }
 0x175   :  { %v2389_v9 = vpop.f32.mrf.mxu1  ;;  %v2997_v31 = vmul.f32 %v4520_v57, %v2911_v7  ;;  %v2914_v14 = vmax.f32 %v2386_v3, 0.0  ;;  %v2388_v39 = vadd.f32 %v2387_v1, %v2275_v20  ;;  %v2277_v53 = vadd.f32 %v2276_v55, %v4414_v15 }
 0x176   :  { %v2278_v11 = vpop.f32.mrf.mxu0 }
 0x177   :  { %v2391_v26 = vpop.f32.mrf.mxu1  ;;  %v4538_v23 = vadd.f32 %v2997_v31, %v2996_v21  ;;  %v2915_v38 = vmax.f32 %v2388_v39, 0.0  ;;  %v2390_v43 = vadd.f32 %v2389_v9, %v2277_v53  ;;  %v2279_v42 = vadd.f32 %v2278_v11, %v4419_v25 }
 0x178   :  { %v2282_v54 = vpop.f32.mrf.mxu0  ;;  %v3000_v41 = vmul.f32 %v4526_v48, %v2914_v14 }
 0x179   :  { %v2395_v47 = vpop.f32.mrf.mxu1  ;;  %v3001_v10 = vmul.f32 %v4520_v57, %v2915_v38  ;;  %v2283_v6 = vadd.f32 %v2282_v54, %v4424_v18  ;;  %v2918_v59 = vmax.f32 %v2390_v43, 0.0  ;;  %v2392_v13 = vadd.f32 %v2391_v26, %v2279_v42 }
 0x17a   :  { %v2284_v35 = vpop.f32.mrf.mxu0 }
 0x17b   :  { %v2397_v15 = vpop.f32.mrf.mxu1  ;;  %v2396_v32 = vadd.f32 %v2395_v47, %v2283_v6  ;;  %v2285_v33 = vadd.f32 %v2284_v35, %v4427_v40  ;;  %v4545_v22 = vadd.f32 %v3001_v10, %v3000_v41  ;;  %v2919_v58 = vmax.f32 %v2392_v13, 0.0 }
 0x17c   :  { %v2286_v51 = vpop.f32.mrf.mxu0  ;;  %v3004_v7 = vmul.f32 %v4526_v48, %v2918_v59 }
 0x17d   :  { %v2399_v25 = vpop.f32.mrf.mxu1  ;;  %v2922_v49 = vmax.f32 %v2396_v32, 0.0  ;;  %v2398_v0 = vadd.f32 %v2397_v15, %v2285_v33  ;;  %v2287_v1 = vadd.f32 %v2286_v51, %v4430_v29  ;;  %v3005_v18 = vmul.f32 %v4520_v57, %v2919_v58 }
 0x17e   :  { %v2288_v3 = vpop.f32.mrf.mxu0 }
 0x17f   :  { %v2401_v20 = vpop.f32.mrf.mxu1  ;;  %v2923_v21 = vmax.f32 %v2398_v0, 0.0  ;;  %v2400_v55 = vadd.f32 %v2399_v25, %v2287_v1  ;;  %v2289_v9 = vadd.f32 %v2288_v3, %v4435_v27  ;;  %v4551_v40 = vadd.f32 %v3005_v18, %v3004_v7 }
 0x180   :  { %v3008_v31 = vmul.f32 %v4526_v48, %v2922_v49  ;;  %v2292_v14 = vpop.f32.mrf.mxu0 }
 0x181   :  { %v2405_v39 = vpop.f32.mrf.mxu1  ;;  %v3009_v53 = vmul.f32 %v4520_v57, %v2923_v21  ;;  %v2926_v11 = vmax.f32 %v2400_v55, 0.0  ;;  %v2402_v29 = vadd.f32 %v2401_v20, %v2289_v9  ;;  %v2293_v26 = vadd.f32 %v2292_v14, %v4440_v52 }
 0x182   :  { %v2294_v38 = vpop.f32.mrf.mxu0 }
 0x183   :  { %v2407_v43 = vpop.f32.mrf.mxu1  ;;  %v4556_v42 = vadd.f32 %v3009_v53, %v3008_v31  ;;  %v2927_v54 = vmax.f32 %v2402_v29, 0.0  ;;  %v2406_v47 = vadd.f32 %v2405_v39, %v2293_v26  ;;  %v2295_v27 = vadd.f32 %v2294_v38, %v4443_v61 }
 0x184   :  { %v2296_v41 = vpop.f32.mrf.mxu0  ;;  %v3012_v6 = vmul.f32 %v4526_v48, %v2926_v11 }
 0x185   :  { %v2409_v10 = vpop.f32.mrf.mxu1  ;;  %v3013_v59 = vmul.f32 %v4520_v57, %v2927_v54  ;;  %v2297_v13 = vadd.f32 %v2296_v41, %v4446_v5  ;;  %v2930_v35 = vmax.f32 %v2406_v47, 0.0  ;;  %v2408_v15 = vadd.f32 %v2407_v43, %v2295_v27 }
 0x186   :  { %v2298_v32 = vpop.f32.mrf.mxu0 }
 0x187   :  { %v2411_v52 = vpop.f32.mrf.mxu1  ;;  %v4562_v33 = vadd.f32 %v3013_v59, %v3012_v6  ;;  %v2410_v58 = vadd.f32 %v2409_v10, %v2297_v13  ;;  %v2299_v51 = vadd.f32 %v2298_v32, %v4451_v8  ;;  %v2931_v25 = vmax.f32 %v2408_v15, 0.0 }
 0x188   :  { %v2302_v49 = vpop.f32.mrf.mxu0  ;;  %v3016_v18 = vmul.f32 %v4526_v48, %v2930_v35 }
 0x189   :  { %v2415_v61 = vpop.f32.mrf.mxu1  ;;  %v2934_v0 = vmax.f32 %v2410_v58, 0.0  ;;  %v2412_v1 = vadd.f32 %v2411_v52, %v2299_v51  ;;  %v2303_v7 = vadd.f32 %v2302_v49, %v4456_v37  ;;  %v3017_v5 = vmul.f32 %v4520_v57, %v2931_v25 }
 0x18a   :  { %v2304_v3 = vpop.f32.mrf.mxu0 }
 0x18b   :  { %v2417_v20 = vpop.f32.mrf.mxu1  ;;  %v2935_v21 = vmax.f32 %v2412_v1, 0.0  ;;  %v2416_v55 = vadd.f32 %v2415_v61, %v2303_v7  ;;  %v2305_v9 = vadd.f32 %v2304_v3, %v4459_v46  ;;  %v4569_v31 = vadd.f32 %v3017_v5, %v3016_v18 }
 0x18c   :  { %v3020_v8 = vmul.f32 %v4526_v48, %v2934_v0  ;;  %v2306_v14 = vpop.f32.mrf.mxu0 }
 0x18d   :  { %5043 = vst [vmem:[#allocation10_spill] sm:$0xff] %v4569_v31  ;;  %v2419_v39 = vpop.f32.mrf.mxu1  ;;  %v3021_v53 = vmul.f32 %v4520_v57, %v2935_v21  ;;  %v2938_v11 = vmax.f32 %v2416_v55, 0.0  ;;  %v2418_v37 = vadd.f32 %v2417_v20, %v2305_v9  ;;  %v2307_v29 = vadd.f32 %v2306_v14, %v4462_v28 }
 0x18e   :  { %v2308_v26 = vpop.f32.mrf.mxu0 }
 0x18f   :  { %v2421_v38 = vpop.f32.mrf.mxu1  ;;  %v4574_v43 = vadd.f32 %v3021_v53, %v3020_v8  ;;  %v2939_v54 = vmax.f32 %v2418_v37, 0.0  ;;  %v2420_v47 = vadd.f32 %v2419_v39, %v2307_v29  ;;  %v2309_v46 = vadd.f32 %v2308_v26, %v4467_v44 }
 0x190   :  { %v2312_v27 = vpop.f32.mrf.mxu0  ;;  %v3024_v10 = vmul.f32 %v4526_v48, %v2938_v11 }
 0x191   :  { %5044 = vst [vmem:[#allocation11_spill] sm:$0xff] %v4574_v43  ;;  %v2425_v41 = vpop.f32.mrf.mxu1  ;;  %v3025_v6 = vmul.f32 %v4520_v57, %v2939_v54  ;;  %v2313_v59 = vadd.f32 %v2312_v27, %v4472_v50  ;;  %v2942_v13 = vmax.f32 %v2420_v47, 0.0  ;;  %v2422_v35 = vadd.f32 %v2421_v38, %v2309_v46 }
 0x192   :  { %v2314_v15 = vpop.f32.mrf.mxu0 }
 0x193   :  { %v2427_v28 = vpop.f32.mrf.mxu1  ;;  %v4580_v32 = vadd.f32 %v3025_v6, %v3024_v10  ;;  %v2426_v52 = vadd.f32 %v2425_v41, %v2313_v59  ;;  %v2315_v58 = vadd.f32 %v2314_v15, %v4475_v62  ;;  %v2943_v51 = vmax.f32 %v2422_v35, 0.0 }
 0x194   :  { %v2316_v25 = vpop.f32.mrf.mxu0  ;;  %v3028_v1 = vmul.f32 %v4526_v48, %v2942_v13 }
 0x195   :  { %5045 = vst [vmem:[#allocation12_spill] sm:$0xff] %v4580_v32  ;;  %v2429_v44 = vpop.f32.mrf.mxu1  ;;  %v2946_v49 = vmax.f32 %v2426_v52, 0.0  ;;  %v2428_v61 = vadd.f32 %v2427_v28, %v2315_v58  ;;  %v2317_v0 = vadd.f32 %v2316_v25, %v4478_v16  ;;  %v3029_v50 = vmul.f32 %v4520_v57, %v2943_v51 }
 0x196   :  { %v2318_v7 = vpop.f32.mrf.mxu0  ;;  %v392_v32 = vsub.s32 2, %v4364_v60 }
 0x197   :  { %v2431_v18 = vpop.f32.mrf.mxu1  ;;  %v2947_v5 = vmax.f32 %v2428_v61, 0.0  ;;  %v2430_v3 = vadd.f32 %v2429_v44, %v2317_v0  ;;  %v2319_v20 = vadd.f32 %v2318_v7, %v4483_v36  ;;  %v4587_v21 = vadd.f32 %v3029_v50, %v3028_v1 }
 0x198   :  { %v3032_v62 = vmul.f32 %v4526_v48, %v2946_v49  ;;  %v2322_v55 = vpop.f32.mrf.mxu0 }
 0x199   :  { %5046 = vst [vmem:[#allocation13_spill] sm:$0xff] %v4587_v21  ;;  %v2435_v9 = vpop.f32.mrf.mxu1  ;;  %v3033_v8 = vmul.f32 %v4520_v57, %v2947_v5  ;;  %v2950_v14 = vmax.f32 %v2430_v3, 0.0  ;;  %v2432_v16 = vadd.f32 %v2431_v18, %v2319_v20  ;;  %v2323_v39 = vadd.f32 %v2322_v55, %v4488_v12 }
 0x19a   :  { %v2324_v53 = vpop.f32.mrf.mxu0 }
 0x19b   :  { %v2437_v11 = vpop.f32.mrf.mxu1  ;;  %v4592_v37 = vadd.f32 %v3033_v8, %v3032_v62  ;;  %v2951_v29 = vmax.f32 %v2432_v16, 0.0  ;;  %v2436_v26 = vadd.f32 %v2435_v9, %v2323_v39  ;;  %v2325_v36 = vadd.f32 %v2324_v53, %v4491_v19 }
 0x19c   :  { %v2326_v38 = vpop.f32.mrf.mxu0  ;;  %v3036_v47 = vmul.f32 %v4526_v48, %v2950_v14 }
 0x19d   :  { %5047 = vst [vmem:[#allocation14_spill] sm:$0xff] %v4592_v37  ;;  %v2439_v54 = vpop.f32.mrf.mxu1  ;;  %v3037_v46 = vmul.f32 %v4520_v57, %v2951_v29  ;;  %v2327_v27 = vadd.f32 %v2326_v38, %v4494_v63  ;;  %v2954_v41 = vmax.f32 %v2436_v26, 0.0  ;;  %v2438_v10 = vadd.f32 %v2437_v11, %v2325_v36 }
 0x19e   :  { %v2328_v6 = vpop.f32.mrf.mxu0 }
 0x19f   :  { %v2441_v12 = vpop.f32.mrf.mxu1  ;;  %v4598_v59 = vadd.f32 %v3037_v46, %v3036_v47  ;;  %v2440_v13 = vadd.f32 %v2439_v54, %v2327_v27  ;;  %v2329_v35 = vadd.f32 %v2328_v6, %v4499_v34  ;;  %v2955_v15 = vmax.f32 %v2438_v10, 0.0 }
 0x1a0   :  { %v2332_v28 = vpop.f32.mrf.mxu0  ;;  %v3040_v25 = vmul.f32 %v4526_v48, %v2954_v41 }
 0x1a1   :  { %5048 = vst [vmem:[#allocation15_spill] sm:$0xff] %v4598_v59  ;;  %v2445_v19 = vpop.f32.mrf.mxu1  ;;  %v2958_v52 = vmax.f32 %v2440_v13, 0.0  ;;  %v2442_v58 = vadd.f32 %v2441_v12, %v2329_v35  ;;  %v2333_v51 = vadd.f32 %v2332_v28, %v4502_v45  ;;  %v3041_v63 = vmul.f32 %v4520_v57, %v2955_v15 }
 0x1a2   :  { %v2334_v44 = vpop.f32.mrf.mxu0 }
 0x1a3   :  { %v2447_v49 = vpop.f32.mrf.mxu1  ;;  %v2959_v61 = vmax.f32 %v2442_v58, 0.0  ;;  %v2446_v0 = vadd.f32 %v2445_v19, %v2333_v51  ;;  %v2335_v1 = vadd.f32 %v2334_v44, %v4505_v2  ;;  %v4605_v50 = vadd.f32 %v3041_v63, %v3040_v25 }
 0x1a4   :  { %v3044_v34 = vmul.f32 %v4526_v48, %v2958_v52  ;;  %v2336_v7 = vpop.f32.mrf.mxu0 }
 0x1a5   :  { %5049 = vst [vmem:[#allocation16_spill] sm:$0xff] %v4605_v50  ;;  %v2449_v18 = vpop.f32.mrf.mxu1  ;;  %v3045_v5 = vmul.f32 %v4520_v57, %v2959_v61  ;;  %v2962_v3 = vmax.f32 %v2446_v0, 0.0  ;;  %v2448_v45 = vadd.f32 %v2447_v49, %v2335_v1  ;;  %v2337_v20 = vadd.f32 %v2336_v7, %v4508_v4 }
 0x1a6   :  { %v2338_v62 = vpop.f32.mrf.mxu0 }
 0x1a7   :  { %v2451_v55 = vpop.f32.mrf.mxu1  ;;  %v4610_v9 = vadd.f32 %v3045_v5, %v3044_v34  ;;  %v2963_v8 = vmax.f32 %v2448_v45, 0.0  ;;  %v2450_v14 = vadd.f32 %v2449_v18, %v2337_v20  ;;  %v2339_v2 = vadd.f32 %v2338_v62, %v4511_v17 }
 0x1a8   :  { %v4613_v16 = vpop.f32.mrf.mxu0  ;;  %v3048_v53 = vmul.f32 %v4526_v48, %v2962_v3 }
 0x1a9   :  { %5050 = vst [vmem:[#allocation17_spill] sm:$0xff] %v4610_v9  ;;  %v4615_v39 = vpop.f32.mrf.mxu1  ;;  %v3049_v11 = vmul.f32 %v4520_v57, %v2963_v8  ;;  %v2966_v29 = vmax.f32 %v2450_v14, 0.0  ;;  %v2452_v26 = vadd.f32 %v2451_v55, %v2339_v2 }
 0x1aa   :  { %v4619_v36 = vpop.f32.mrf.mxu0 }
 0x1ab   :  { %v4621_v4 = vpop.f32.mrf.mxu1  ;;  %v4623_v38 = vadd.f32 %v3049_v11, %v3048_v53  ;;  %v2967_v54 = vmax.f32 %v2452_v26, 0.0  ;;  %v3052_v46 = vmul.f32 %v4526_v48, %v2966_v29 }
 0x1ac   :  { %v4625_v47 = vpop.f32.mrf.mxu0 }
 0x1ad   :  { %5051 = vst [vmem:[#allocation18_spill] sm:$0xff] %v4623_v38  ;;  %v4627_v17 = vpop.f32.mrf.mxu1  ;;  %v3053_v27 = vmul.f32 %v4520_v57, %v2967_v54 }
 0x1ae   :  { %v4631_v41 = vpop.f32.mrf.mxu0 }
 0x1af   :  { %v4633_v10 = vpop.f32.mrf.mxu1  ;;  %v4635_v6 = vadd.f32 %v3053_v27, %v3052_v46 }
 0x1b0   :  { %v4637_v12 = vpop.f32.mrf.mxu0 }
 0x1b1   :  { %5052 = vst [vmem:[#allocation19_spill] sm:$0xff] %v4635_v6  ;;  %v4639_v13 = vpop.f32.mrf.mxu1 }
 0x1b2   :  { %v4641_v35 = vpop.f32.mrf.mxu0 }
 0x1b3   :  { %v4643_v15 = vpop.f32.mrf.mxu1 }
 0x1b4   :  { %v4645_v28 = vpop.f32.mrf.mxu0 }
 0x1b5   :  { %v4647_v19 = vpop.f32.mrf.mxu1 }
 0x1b6   :  { %v4649_v48 = vpop.f32.mrf.mxu0 }
 0x1b7   :  { %v4651_v57 = vpop.f32.mrf.mxu1 }
 0x1b8   :  { %v4653_v52 = vpop.f32.mrf.mxu0 }
 0x1b9   :  { %v4655_v58 = vpop.f32.mrf.mxu1 }
 0x1ba   :  { %v4657_v51 = vpop.f32.mrf.mxu0 }
 0x1bb   :  { %v4659_v25 = vpop.f32.mrf.mxu1 }
 0x1bc   :  { %v4661_v63 = vpop.f32.mrf.mxu0 }
 0x1bd   :  { %v4663_v44 = vpop.f32.mrf.mxu1 }
 0x1be   :  { %v4665_v49 = vpop.f32.mrf.mxu0 }
 0x1bf   :  { %v4667_v61 = vpop.f32.mrf.mxu1 }
 0x1c0   :  { %v4669_v0 = vpop.f32.mrf.mxu0 }
 0x1c1   :  { %v4671_v1 = vpop.f32.mrf.mxu1 }
 0x1c2   :  { %v4673_v34 = vpop.f32.mrf.mxu0 }
 0x1c3   :  { %v4675_v7 = vpop.f32.mrf.mxu1 }
 0x1c4   :  { %v4677_v18 = vpop.f32.mrf.mxu0 }
 0x1c5   :  { %v4679_v5 = vpop.f32.mrf.mxu1 }
 0x1c6   :  { %v4681_v3 = vpop.f32.mrf.mxu0 }
 0x1c7   :  { %v4683_v45 = vpop.f32.mrf.mxu1 }
 0x1c8   :  { %v4685_v20 = vpop.f32.mrf.mxu0 }
 0x1c9   :  { %v4687_v62 = vpop.f32.mrf.mxu1 }
 0x1ca   :  { %v4689_v55 = vpop.f32.mrf.mxu0 }
 0x1cb   :  { %v4691_v8 = vpop.f32.mrf.mxu1 }
 0x1cc   :  { %v4693_v14 = vpop.f32.mrf.mxu0 }
 0x1cd   :  { %v4695_v2 = vpop.f32.mrf.mxu1 }
 0x1ce   :  { %v4697_v53 = vpop.f32.mrf.mxu0 }
 0x1cf   :  { %v4699_v11 = vpop.f32.mrf.mxu1 }
 0x1d0   :  { %5053 = vst [vmem:[#allocation20_spill] sm:$0xff] %v4699_v11  ;;  %v4701_v29 = vpop.f32.mrf.mxu0 }
 0x1d1   :  { %v4703_v26 = vpop.f32.mrf.mxu1 }
 0x1d2   :  { %5054 = vst [vmem:[#allocation21_spill] sm:$0xff] %v4703_v26  ;;  %v4705_v54 = vpop.f32.mrf.mxu0 }
 0x1d3   :  { %5055 = vst [vmem:[#allocation22_spill] sm:$0xff] %v4705_v54  ;;  %v4707_v46 = vpop.f32.mrf.mxu1 }
 0x1d4   :  { %5056 = vst [vmem:[#allocation23_spill] sm:$0xff] %v4707_v46  ;;  %v4709_v27 = vpop.f32.mrf.mxu0 }
 0x1d5   :  { %5057 = vst [vmem:[#allocation24_spill] sm:$0xff] %v4709_v27  ;;  %v4711_v6 = vpop.f32.mrf.mxu1 }
 0x1d6   :  { %5058 = vst [vmem:[#allocation25_spill] sm:$0xff] %v4711_v6  ;;  %v4713_v38 = vpop.f32.mrf.mxu0  ;;  %v396_v6 = vsub.s32 3, %v4364_v60 }
 0x1d7   :  { %5059 = vst [vmem:[#allocation26_spill] sm:$0xff] %v4713_v38  ;;  %v4715_v9 = vpop.f32.mrf.mxu1 }
 0x1d8   :  { %5060 = vst [vmem:[#allocation27_spill] sm:$0xff] %v4715_v9  ;;  %v4717_v50 = vpop.f32.mrf.mxu0  ;;  %v4736_v9 = vrot.slane %v4372_v56, %v392_v32 }
 0x1d9   :  { %5061 = vst [vmem:[#allocation28_spill] sm:$0xff] %v4717_v50  ;;  %v4719_v59 = vpop.f32.mrf.mxu1 }
 0x1da   :  { %5062 = vst [vmem:[#allocation29_spill] sm:$0xff] %v4719_v59  ;;  %v4721_v37 = vpop.f32.mrf.mxu0  ;;  %v2489_v60 = vadd.f32 %v4613_v16, %v4736_v9 }
 0x1db   :  { %5063 = vst [vmem:[#allocation30_spill] sm:$0xff] %v4721_v37  ;;  %v4723_v21 = vpop.f32.mrf.mxu1 }
 0x1dc   :  { %5064 = vst [vmem:[#allocation31_spill] sm:$0xff] %v4723_v21  ;;  %v4726_v43 = vpop.f32.mrf.mxu0  ;;  %v4743_v21 = vrot.slane %v4372_v56, %v396_v6  ;;  %v2602_v56 = vadd.f32 %v4615_v39, %v2489_v60  ;;  %v4771_v39 = vrot.slane %v4514_v24, %v392_v32  ;;  %v2503_v32 = vadd.f32 %v4645_v28, %v4736_v9 }
 0x1dd   :  { %5065 = vst [vmem:[#allocation32_spill] sm:$0xff] %v4726_v43  ;;  %v4728_v46 = vpop.f32.mrf.mxu1 }
 0x1de   :  { %5066 = vst [vmem:[#allocation33_spill] sm:$0xff] %v4728_v46  ;;  %v4731_v27 = vpop.f32.mrf.mxu0  ;;  %v2501_v60 = vadd.f32 %v4641_v35, %v4743_v21  ;;  %v2616_v28 = vadd.f32 %v4647_v19, %v2503_v32 }
 0x1df   :  { %5067 = vst [vmem:[#allocation34_spill] sm:$0xff] %v4731_v27  ;;  %v4733_v38 = vpop.f32.mrf.mxu1  ;;  %v2491_v27 = vadd.f32 %v4619_v36, %v4743_v21  ;;  %v2499_v36 = vadd.f32 %v4637_v12, %v4736_v9 }
 0x1e0   :  { %5068 = vst [vmem:[#allocation35_spill] sm:$0xff] %v4733_v38  ;;  %v4738_v59 = vpop.f32.mrf.mxu0 }
 0x1e1   :  { %5069 = vst [vmem:[#allocation36_spill] sm:$0xff] %v4738_v59  ;;  %v4740_v37 = vpop.f32.mrf.mxu1  ;;  %v2604_v16 = vadd.f32 %v4621_v4, %v2491_v27 }
 0x1e2   :  { %5070 = vst [vmem:[#allocation37_spill] sm:$0xff] %v4740_v37  ;;  %v4745_v50 = vpop.f32.mrf.mxu0 }
 0x1e3   :  { %5071 = vst [vmem:[#allocation38_spill] sm:$0xff] %v4745_v50  ;;  %v4747_v43 = vpop.f32.mrf.mxu1  ;;  %v2493_v50 = vadd.f32 %v4625_v47, %v4736_v9 }
 0x1e4   :  { %5072 = vst [vmem:[#allocation39_spill] sm:$0xff] %v4747_v43  ;;  %v4751_v46 = vpop.f32.mrf.mxu0 }
 0x1e5   :  { %5073 = vst [vmem:[#allocation40_spill] sm:$0xff] %v4751_v46  ;;  %v4753_v38 = vpop.f32.mrf.mxu1  ;;  %v2495_v46 = vadd.f32 %v4631_v41, %v4743_v21  ;;  %v4776_v41 = vrot.slane %v4514_v24, %v396_v6  ;;  %v2614_v24 = vadd.f32 %v4643_v15, %v2501_v60 }
 0x1e6   :  { %5074 = vst [vmem:[#allocation41_spill] sm:$0xff] %v4753_v38  ;;  %v4757_v59 = vpop.f32.mrf.mxu0 }
 0x1e7   :  { %5075 = vst [vmem:[#allocation42_spill] sm:$0xff] %v4757_v59  ;;  %v4759_v37 = vpop.f32.mrf.mxu1 }
 0x1e8   :  { %5076 = vst [vmem:[#allocation43_spill] sm:$0xff] %v4759_v37  ;;  %v2714_v43 = vpop.f32.mrf.mxu0  ;;  %v2606_v37 = vadd.f32 %v4627_v17, %v2493_v50  ;;  %v2612_v50 = vadd.f32 %v4639_v13, %v2499_v36  ;;  %v2509_v36 = vadd.f32 %v4653_v52, %v4736_v9 }
 0x1e9   :  { %v2827_v26 = vpop.f32.mrf.mxu1  ;;  %v2715_v38 = vadd.f32 %v2714_v43, %v2602_v56  ;;  %v2608_v43 = vadd.f32 %v4633_v10, %v2495_v46  ;;  %v2505_v10 = vadd.f32 %v4649_v48, %v4743_v21 }
 0x1ea   :  { %v2716_v54 = vpop.f32.mrf.mxu0 }
 0x1eb   :  { %v2829_v59 = vpop.f32.mrf.mxu1  ;;  %v2828_v11 = vadd.f32 %v2827_v26, %v2715_v38  ;;  %v2717_v47 = vadd.f32 %v2716_v54, %v2604_v16 }
 0x1ec   :  { %v2718_v4 = vpop.f32.mrf.mxu0 }
 0x1ed   :  { %v2831_v27 = vpop.f32.mrf.mxu1  ;;  %v2908_v12 = vmax.f32 %v2828_v11, 0.0  ;;  %v2830_v56 = vadd.f32 %v2829_v59, %v2717_v47  ;;  %v2719_v31 = vadd.f32 %v2718_v4, %v2606_v37 }
 0x1ee   :  { %v2720_v38 = vpop.f32.mrf.mxu0 }
 0x1ef   :  { %v2833_v17 = vpop.f32.mrf.mxu1  ;;  %v2994_v26 = vmul.f32 %v4771_v39, %v2908_v12  ;;  %v2909_v35 = vmax.f32 %v2830_v56, 0.0  ;;  %v2832_v54 = vadd.f32 %v2831_v27, %v2719_v31  ;;  %v2721_v16 = vadd.f32 %v2720_v38, %v2608_v43 }
 0x1f0   :  { %v2724_v6 = vpop.f32.mrf.mxu0  ;;  %v2618_v43 = vadd.f32 %v4651_v57, %v2505_v10  ;;  %v2511_v12 = vadd.f32 %v4657_v51, %v4743_v21 }
 0x1f1   :  { %v2837_v59 = vpop.f32.mrf.mxu1  ;;  %v2912_v37 = vmax.f32 %v2832_v54, 0.0  ;;  %v2834_v11 = vadd.f32 %v2833_v17, %v2721_v16  ;;  %v2725_v13 = vadd.f32 %v2724_v6, %v2612_v50  ;;  %v2995_v46 = vmul.f32 %v4776_v41, %v2909_v35 }
 0x1f2   :  { %v2726_v47 = vpop.f32.mrf.mxu0  ;;  %v3057_v4 = vadd.f32 %v4534_v30, %v2994_v26  ;;  %v2622_v30 = vadd.f32 %v4655_v58, %v2509_v36  ;;  %v2513_v26 = vadd.f32 %v4661_v63, %v4736_v9  ;;  %v2624_v6 = vadd.f32 %v4659_v25, %v2511_v12 }
 0x1f3   :  { %v2839_v31 = vpop.f32.mrf.mxu1  ;;  %v2998_v15 = vmul.f32 %v4771_v39, %v2912_v37  ;;  %v2913_v60 = vmax.f32 %v2834_v11, 0.0  ;;  %v2838_v48 = vadd.f32 %v2837_v59, %v2725_v13  ;;  %v2727_v27 = vadd.f32 %v2726_v47, %v2614_v24 }
 0x1f4   :  { %v2728_v56 = vpop.f32.mrf.mxu0  ;;  %v3058_v19 = vadd.f32 %v3057_v4, %v2995_v46  ;;  %v2515_v59 = vadd.f32 %v4665_v49, %v4743_v21  ;;  %v2519_v36 = vadd.f32 %v4669_v0, %v4736_v9 }
 0x1f5   :  { %v2841_v50 = vpop.f32.mrf.mxu1  ;;  %v2999_v32 = vmul.f32 %v4776_v41, %v2913_v60  ;;  %v2916_v52 = vmax.f32 %v2838_v48, 0.0  ;;  %v2840_v38 = vadd.f32 %v2839_v31, %v2727_v27  ;;  %v2729_v17 = vadd.f32 %v2728_v56, %v2616_v28 }
 0x1f6   :  { %3059 = vadd.xlane.f32.xlu0 %v3058_v19  ;;  %v2730_v35 = vpop.f32.mrf.mxu0  ;;  %v3062_v57 = vadd.f32 %v4538_v23, %v2998_v15  ;;  %v2626_v23 = vadd.f32 %v4663_v44, %v2513_v26  ;;  %v2628_v48 = vadd.f32 %v4667_v61, %v2515_v59  ;;  %v2521_v27 = vadd.f32 %v4673_v34, %v4743_v21 }
 0x1f7   :  { %v2843_v54 = vpop.f32.mrf.mxu1  ;;  %v3002_v51 = vmul.f32 %v4771_v39, %v2916_v52  ;;  %v2917_v16 = vmax.f32 %v2840_v38, 0.0  ;;  %v2842_v24 = vadd.f32 %v2841_v50, %v2729_v17  ;;  %v2731_v10 = vadd.f32 %v2730_v35, %v2618_v43 }
 0x1f8   :  { %v2734_v37 = vpop.f32.mrf.mxu0  ;;  %v3063_v11 = vadd.f32 %v3062_v57, %v2999_v32  ;;  %v2523_v32 = vadd.f32 %v4677_v18, %v4736_v9  ;;  %v2634_v35 = vadd.f32 %v4675_v7, %v2521_v27 }
 0x1f9   :  { %v2847_v58 = vpop.f32.mrf.mxu1  ;;  %v2920_v13 = vmax.f32 %v2842_v24, 0.0  ;;  %v2844_v63 = vadd.f32 %v2843_v54, %v2731_v10  ;;  %v2735_v46 = vadd.f32 %v2734_v37, %v2622_v30  ;;  %v3003_v28 = vmul.f32 %v4776_v41, %v2917_v16 }
 0x1fa   :  { %3064 = vadd.xlane.f32.xlu0 %v3063_v11  ;;  %v2736_v47 = vpop.f32.mrf.mxu0  ;;  %v3067_v25 = vadd.f32 %v4545_v22, %v3002_v51  ;;  %v2632_v22 = vadd.f32 %v4671_v1, %v2519_v36  ;;  %v2525_v54 = vadd.f32 %v4681_v3, %v4743_v21 }
 0x1fb   :  { %v2849_v31 = vpop.f32.mrf.mxu1  ;;  %v3006_v49 = vmul.f32 %v4771_v39, %v2920_v13  ;;  %v2921_v4 = vmax.f32 %v2844_v63, 0.0  ;;  %v2848_v15 = vadd.f32 %v2847_v58, %v2735_v46  ;;  %v2737_v60 = vadd.f32 %v2736_v47, %v2624_v6 }
 0x1fc   :  { %v2738_v43 = vpop.f32.mrf.mxu0  ;;  %v3068_v12 = vadd.f32 %v3067_v25, %v3003_v28  ;;  %v2529_v6 = vadd.f32 %v4685_v20, %v4736_v9  ;;  %v2638_v63 = vadd.f32 %v4683_v45, %v2525_v54  ;;  %v2531_v46 = vadd.f32 %v4689_v55, %v4743_v21 }
 0x1fd   :  { %v2851_v44 = vpop.f32.mrf.mxu1  ;;  %v3007_v0 = vmul.f32 %v4776_v41, %v2921_v4  ;;  %v2924_v56 = vmax.f32 %v2848_v15, 0.0  ;;  %v2850_v50 = vadd.f32 %v2849_v31, %v2737_v60  ;;  %v2739_v19 = vadd.f32 %v2738_v43, %v2626_v23 }
 0x1fe   :  { %3069 = vadd.xlane.f32.xlu1 %v3068_v12  ;;  %v2740_v52 = vpop.f32.mrf.mxu0  ;;  %v3072_v61 = vadd.f32 %v4551_v40, %v3006_v49  ;;  %v2636_v40 = vadd.f32 %v4679_v5, %v2523_v32  ;;  %v2533_v25 = vadd.f32 %v4693_v14, %v4736_v9  ;;  %v2644_v27 = vadd.f32 %v4691_v8, %v2531_v46  ;;  %v5077_v8 = vld [vmem:[#allocation10_spill] sm:$0xff] }
 0x1ff   :  { %v2853_v38 = vpop.f32.mrf.mxu1  ;;  %v3010_v34 = vmul.f32 %v4771_v39, %v2924_v56  ;;  %v2925_v17 = vmax.f32 %v2850_v50, 0.0  ;;  %v2852_v30 = vadd.f32 %v2851_v44, %v2739_v19  ;;  %v2741_v26 = vadd.f32 %v2740_v52, %v2628_v48 }
 0x200   :  { %v2744_v57 = vpop.f32.mrf.mxu0  ;;  %v3073_v51 = vadd.f32 %v3072_v61, %v3007_v0  ;;  %v2535_v43 = vadd.f32 %v4697_v53, %v4743_v21  ;;  %v2539_v19 = vadd.f32 %v4701_v29, %v4736_v9 }
 0x201   :  { %v2857_v1 = vpop.f32.mrf.mxu1  ;;  %v3011_v18 = vmul.f32 %v4776_v41, %v2925_v17  ;;  %v2928_v16 = vmax.f32 %v2852_v30, 0.0  ;;  %v2854_v24 = vadd.f32 %v2853_v38, %v2741_v26  ;;  %v2745_v10 = vadd.f32 %v2744_v57, %v2632_v22  ;;  %v5078_v17 = vld [vmem:[#allocation20_spill] sm:$0xff]  ;;  %v5079_v26 = vld [vmem:[#allocation22_spill] sm:$0xff] }
 0x202   :  { %3074 = vadd.xlane.f32.xlu1 %v3073_v51  ;;  %v2746_v59 = vpop.f32.mrf.mxu0  ;;  %v3077_v7 = vadd.f32 %v4556_v42, %v3010_v34  ;;  %v2642_v42 = vadd.f32 %v4687_v62, %v2529_v6  ;;  %v2648_v30 = vadd.f32 %v5078_v17, %v2535_v43 }
 0x203   :  { %v2859_v37 = vpop.f32.mrf.mxu1  ;;  %v3014_v3 = vmul.f32 %v4771_v39, %v2928_v16  ;;  %v2929_v58 = vmax.f32 %v2854_v24, 0.0  ;;  %v2858_v11 = vadd.f32 %v2857_v1, %v2745_v10  ;;  %v2747_v13 = vadd.f32 %v2746_v59, %v2634_v35  ;;  %v5080_v16 = vld [vmem:[#allocation21_spill] sm:$0xff]  ;;  %v5081_v10 = vld [vmem:[#allocation24_spill] sm:$0xff] }
 0x204   :  { %v2748_v28 = vpop.f32.mrf.mxu0  ;;  %v3078_v23 = vadd.f32 %v3077_v7, %v3011_v18  ;;  %v2541_v35 = vadd.f32 %v5079_v26, %v4743_v21  ;;  %v2652_v24 = vadd.f32 %v5080_v16, %v2539_v19  ;;  %v5094_v16 = vld [vmem:[#allocation34_spill] sm:$0xff] }
 0x205   :  { %v2861_v5 = vpop.f32.mrf.mxu1  ;;  %v3015_v20 = vmul.f32 %v4776_v41, %v2929_v58  ;;  %v2932_v36 = vmax.f32 %v2858_v11, 0.0  ;;  %v2860_v47 = vadd.f32 %v2859_v37, %v2747_v13  ;;  %v2749_v31 = vadd.f32 %v2748_v28, %v2636_v40  ;;  %v5082_v37 = vld [vmem:[#allocation11_spill] sm:$0xff]  ;;  %v5084_v28 = vld [vmem:[#allocation26_spill] sm:$0xff] }
 0x206   :  { %3079 = vadd.xlane.f32.xlu0 %v3078_v23  ;;  %v2750_v49 = vpop.f32.mrf.mxu0  ;;  %v3082_v45 = vadd.f32 %v4562_v33, %v3014_v3  ;;  %v2646_v33 = vadd.f32 %v4695_v2, %v2533_v25  ;;  %v2543_v40 = vadd.f32 %v5081_v10, %v4736_v9 }
 0x207   :  { %v2863_v4 = vpop.f32.mrf.mxu1  ;;  %v3018_v55 = vmul.f32 %v4771_v39, %v2932_v36  ;;  %v2933_v15 = vmax.f32 %v2860_v47, 0.0  ;;  %v2862_v60 = vadd.f32 %v2861_v5, %v2749_v31  ;;  %v2751_v48 = vadd.f32 %v2750_v49, %v2638_v63  ;;  %v5083_v63 = vld [vmem:[#allocation23_spill] sm:$0xff]  ;;  %v5085_v49 = vld [vmem:[#allocation25_spill] sm:$0xff] }
 0x208   :  { %v2754_v44 = vpop.f32.mrf.mxu0  ;;  %v3083_v12 = vadd.f32 %v3082_v45, %v3015_v20  ;;  %v2654_v46 = vadd.f32 %v5083_v63, %v2541_v35  ;;  %v2545_v5 = vadd.f32 %v5084_v28, %v4743_v21  ;;  %v5086_v45 = vld [vmem:[#allocation28_spill] sm:$0xff]  ;;  %v5092_v35 = vld [vmem:[#allocation13_spill] sm:$0xff] }
 0x209   :  { %v2867_v62 = vpop.f32.mrf.mxu1  ;;  %v3019_v14 = vmul.f32 %v4776_v41, %v2933_v15  ;;  %v2936_v0 = vmax.f32 %v2862_v60, 0.0  ;;  %v2864_v56 = vadd.f32 %v2863_v4, %v2751_v48  ;;  %v2755_v50 = vadd.f32 %v2754_v44, %v2642_v42  ;;  %v5087_v48 = vld [vmem:[#allocation12_spill] sm:$0xff] }
 0x20a   :  { %3084 = vadd.xlane.f32.xlu1 %v3083_v12  ;;  %v2756_v22 = vpop.f32.mrf.mxu0  ;;  %v3087_v52 = vadd.f32 %v5077_v8, %v3018_v55  ;;  %v2656_v4 = vadd.f32 %v5085_v49, %v2543_v40  ;;  %v2549_v55 = vadd.f32 %v5086_v45, %v4736_v9  ;;  %v5099_v49 = vld [vmem:[#allocation38_spill] sm:$0xff] }
 0x20b   :  { %v2869_v32 = vpop.f32.mrf.mxu1  ;;  %v3022_v53 = vmul.f32 %v4771_v39, %v2936_v0  ;;  %v2937_v38 = vmax.f32 %v2864_v56, 0.0  ;;  %v2868_v61 = vadd.f32 %v2867_v62, %v2755_v50  ;;  %v2757_v34 = vadd.f32 %v2756_v22, %v2644_v27  ;;  %v5089_v56 = vld [vmem:[#allocation30_spill] sm:$0xff] }
 0x20c   :  { %v2758_v54 = vpop.f32.mrf.mxu0  ;;  %v3088_v57 = vadd.f32 %v3087_v52, %v3019_v14  ;;  %v5088_v14 = vld [vmem:[#allocation27_spill] sm:$0xff]  ;;  %v2551_v50 = vadd.f32 %v5089_v56, %v4743_v21 }
 0x20d   :  { %v2871_v2 = vpop.f32.mrf.mxu1  ;;  %v3023_v29 = vmul.f32 %v4776_v41, %v2937_v38  ;;  %v2940_v1 = vmax.f32 %v2868_v61, 0.0  ;;  %v2870_v51 = vadd.f32 %v2869_v32, %v2757_v34  ;;  %v2759_v18 = vadd.f32 %v2758_v54, %v2646_v33  ;;  %v5090_v38 = vld [vmem:[#allocation29_spill] sm:$0xff]  ;;  %v5091_v34 = vld [vmem:[#allocation32_spill] sm:$0xff] }
 0x20e   :  { %3089 = vadd.xlane.f32.xlu0 %v3088_v57  ;;  %v2760_v6 = vpop.f32.mrf.mxu0  ;;  %v3092_v7 = vadd.f32 %v5082_v37, %v3022_v53  ;;  %v2658_v0 = vadd.f32 %v5088_v14, %v2545_v5  ;;  %v2662_v61 = vadd.f32 %v5090_v38, %v2549_v55  ;;  %v2553_v17 = vadd.f32 %v5091_v34, %v4736_v9  ;;  %v5097_v5 = vld [vmem:[#allocation14_spill] sm:$0xff] }
 0x20f   :  { %v2873_v59 = vpop.f32.mrf.mxu1  ;;  %v3026_v3 = vmul.f32 %v4771_v39, %v2940_v1  ;;  %v2941_v58 = vmax.f32 %v2870_v51, 0.0  ;;  %v2872_v11 = vadd.f32 %v2871_v2, %v2759_v18  ;;  %v2761_v13 = vadd.f32 %v2760_v6, %v2648_v30  ;;  %v5093_v51 = vld [vmem:[#allocation31_spill] sm:$0xff]  ;;  %v5104_v38 = vld [vmem:[#allocation42_spill] sm:$0xff] }
 0x210   :  { %v2764_v23 = vpop.f32.mrf.mxu0  ;;  %v3093_v36 = vadd.f32 %v3092_v7, %v3023_v29  ;;  %v2664_v18 = vadd.f32 %v5093_v51, %v2551_v50  ;;  %v5102_v50 = vld [vmem:[#allocation15_spill] sm:$0xff]  ;;  %v5106_v51 = vld [vmem:[#allocation16_spill] sm:$0xff] }
 0x211   :  { %v2877_v20 = vpop.f32.mrf.mxu1  ;;  %v3027_v47 = vmul.f32 %v4776_v41, %v2941_v58  ;;  %v2944_v31 = vmax.f32 %v2872_v11, 0.0  ;;  %v2874_v42 = vadd.f32 %v2873_v59, %v2761_v13  ;;  %v2765_v25 = vadd.f32 %v2764_v23, %v2652_v24  ;;  %v5095_v58 = vld [vmem:[#allocation33_spill] sm:$0xff]  ;;  %v5096_v13 = vld [vmem:[#allocation36_spill] sm:$0xff] }
 0x212   :  { %3094 = vadd.xlane.f32.xlu1 %v3093_v36  ;;  %v2766_v15 = vpop.f32.mrf.mxu0  ;;  %v3097_v27 = vadd.f32 %v5087_v48, %v3026_v3  ;;  %v2555_v24 = vadd.f32 %v5094_v16, %v4743_v21  ;;  %v2666_v11 = vadd.f32 %v5095_v58, %v2553_v17  ;;  %v2559_v63 = vadd.f32 %v5096_v13, %v4736_v9 }
 0x213   :  { %v2879_v60 = vpop.f32.mrf.mxu1  ;;  %v3030_v43 = vmul.f32 %v4771_v39, %v2944_v31  ;;  %v2945_v44 = vmax.f32 %v2874_v42, 0.0  ;;  %v2878_v62 = vadd.f32 %v2877_v20, %v2765_v25  ;;  %v2767_v12 = vadd.f32 %v2766_v15, %v2654_v46  ;;  %v5098_v42 = vld [vmem:[#allocation35_spill] sm:$0xff] }
 0x214   :  { %v2768_v33 = vpop.f32.mrf.mxu0  ;;  %v3098_v22 = vadd.f32 %v3097_v27, %v3027_v47  ;;  %v2668_v25 = vadd.f32 %v5098_v42, %v2555_v24 }
 0x215   :  { %v2881_v19 = vpop.f32.mrf.mxu1  ;;  %v3031_v32 = vmul.f32 %v4776_v41, %v2945_v44  ;;  %v2948_v8 = vmax.f32 %v2878_v62, 0.0  ;;  %v2880_v52 = vadd.f32 %v2879_v60, %v2767_v12  ;;  %v2769_v53 = vadd.f32 %v2768_v33, %v2656_v4  ;;  %v5100_v44 = vld [vmem:[#allocation37_spill] sm:$0xff]  ;;  %v5101_v12 = vld [vmem:[#allocation40_spill] sm:$0xff] }
 0x216   :  { %3099 = vadd.xlane.f32.xlu0 %v3098_v22  ;;  %v2770_v30 = vpop.f32.mrf.mxu0  ;;  %v3102_v54 = vadd.f32 %v5092_v35, %v3030_v43  ;;  %v2561_v4 = vadd.f32 %v5099_v49, %v4743_v21  ;;  %v2672_v62 = vadd.f32 %v5100_v44, %v2559_v63  ;;  %v2563_v14 = vadd.f32 %v5101_v12, %v4736_v9 }
 0x217   :  { %v2883_v26 = vpop.f32.mrf.mxu1  ;;  %v3034_v2 = vmul.f32 %v4771_v39, %v2948_v8  ;;  %v2949_v57 = vmax.f32 %v2880_v52, 0.0  ;;  %v2882_v29 = vadd.f32 %v2881_v19, %v2769_v53  ;;  %v2771_v1 = vadd.f32 %v2770_v30, %v2658_v0  ;;  %v5103_v52 = vld [vmem:[#allocation39_spill] sm:$0xff] }
 0x218   :  { %v2774_v10 = vpop.f32.mrf.mxu0  ;;  %v3103_v6 = vadd.f32 %v3102_v54, %v3031_v32  ;;  %v2674_v53 = vadd.f32 %v5103_v52, %v2561_v4  ;;  %v5109_v4 = vld [vmem:[#allocation18_spill] sm:$0xff] }
 0x219   :  { %v2887_v40 = vpop.f32.mrf.mxu1  ;;  %v3035_v59 = vmul.f32 %v4776_v41, %v2949_v57  ;;  %v2952_v37 = vmax.f32 %v2882_v29, 0.0  ;;  %v2884_v7 = vadd.f32 %v2883_v26, %v2771_v1  ;;  %v2775_v3 = vadd.f32 %v2774_v10, %v2662_v61 }
 0x21a   :  { %3104 = vadd.xlane.f32.xlu1 %v3103_v6  ;;  %v2776_v46 = vpop.f32.mrf.mxu0  ;;  %v3107_v23 = vadd.f32 %v5097_v5, %v3034_v2  ;;  %v2565_v61 = vadd.f32 %v5104_v38, %v4743_v21  ;;  %v5105_v2 = vld [vmem:[#allocation41_spill] sm:$0xff] }
 0x21b   :  { %v2889_v28 = vpop.f32.mrf.mxu1  ;;  %v3038_v20 = vmul.f32 %v4771_v39, %v2952_v37  ;;  %v2953_v36 = vmax.f32 %v2884_v7, 0.0  ;;  %v2888_v47 = vadd.f32 %v2887_v40, %v2775_v3  ;;  %v2777_v31 = vadd.f32 %v2776_v46, %v2664_v18  ;;  %v5107_v40 = vld [vmem:[#allocation43_spill] sm:$0xff]  ;;  %v5108_v46 = vld [vmem:[#allocation17_spill] sm:$0xff] }
 0x21c   :  { %v2778_v45 = vpop.f32.mrf.mxu0  ;;  %v3108_v15 = vadd.f32 %v3107_v23, %v3035_v59  ;;  %v2676_v57 = vadd.f32 %v5105_v2, %v2563_v14  ;;  %v2678_v6 = vadd.f32 %v5107_v40, %v2565_v61 }
 0x21d   :  { %v2891_v55 = vpop.f32.mrf.mxu1  ;;  %v3039_v60 = vmul.f32 %v4776_v41, %v2953_v36  ;;  %v2956_v48 = vmax.f32 %v2888_v47, 0.0  ;;  %v2890_v27 = vadd.f32 %v2889_v28, %v2777_v31  ;;  %v2779_v43 = vadd.f32 %v2778_v45, %v2666_v11 }
 0x21e   :  { %3109 = vadd.xlane.f32.xlu0 %v3108_v15  ;;  %v2780_v0 = vpop.f32.mrf.mxu0  ;;  %v3112_v33 = vadd.f32 %v5102_v50, %v3038_v20 }
 0x21f   :  { %v2893_v56 = vpop.f32.mrf.mxu1  ;;  %v3042_v19 = vmul.f32 %v4771_v39, %v2956_v48  ;;  %v2957_v22 = vmax.f32 %v2890_v27, 0.0  ;;  %v2892_v32 = vadd.f32 %v2891_v55, %v2779_v43  ;;  %v2781_v8 = vadd.f32 %v2780_v0, %v2668_v25  ;;  %v5110_v27 = vld [vmem:[#allocation19_spill] sm:$0xff] }
 0x220   :  { %v2784_v34 = vpop.f32.mrf.mxu0  ;;  %v3113_v30 = vadd.f32 %v3112_v33, %v3039_v60 }
 0x221   :  { %v2897_v17 = vpop.f32.mrf.mxu1  ;;  %v3043_v9 = vmul.f32 %v4776_v41, %v2957_v22  ;;  %v2960_v26 = vmax.f32 %v2892_v32, 0.0  ;;  %v2894_v35 = vadd.f32 %v2893_v56, %v2781_v8  ;;  %v2785_v54 = vadd.f32 %v2784_v34, %v2672_v62 }
 0x222   :  { %3114 = vadd.xlane.f32.xlu1 %v3113_v30  ;;  %v2786_v29 = vpop.f32.mrf.mxu0  ;;  %v3117_v18 = vadd.f32 %v5106_v51, %v3042_v19  ;;  %v4910_v62 = vstv %s4996_s4 }
 0x223   :  { %v2899_v1 = vpop.f32.mrf.mxu1  ;;  %v3046_v16 = vmul.f32 %v4771_v39, %v2960_v26  ;;  %v2961_v24 = vmax.f32 %v2894_v35, 0.0  ;;  %v2898_v10 = vadd.f32 %v2897_v17, %v2785_v54  ;;  %v2787_v21 = vadd.f32 %v2786_v29, %v2674_v53 }
 0x224   :  { %v2788_v59 = vpop.f32.mrf.mxu0  ;;  %v3118_v7 = vadd.f32 %v3117_v18, %v3043_v9 }
 0x225   :  { %v2901_v37 = vpop.f32.mrf.mxu1  ;;  %v3047_v3 = vmul.f32 %v4776_v41, %v2961_v24  ;;  %v2964_v58 = vmax.f32 %v2898_v10, 0.0  ;;  %v2900_v11 = vadd.f32 %v2899_v1, %v2787_v21  ;;  %v2789_v13 = vadd.f32 %v2788_v59, %v2676_v57 }
 0x226   :  { %3119 = vadd.xlane.f32.xlu0 %v3118_v7  ;;  %v2790_v63 = vpop.f32.mrf.mxu0  ;;  %v3122_v28 = vadd.f32 %v5108_v46, %v3046_v16 }
 0x227   :  { %v3050_v5 = vmul.f32 %v4771_v39, %v2964_v58  ;;  %v2965_v23 = vmax.f32 %v2900_v11, 0.0  ;;  %v2902_v20 = vadd.f32 %v2901_v37, %v2789_v13  ;;  %v2791_v36 = vadd.f32 %v2790_v63, %v2678_v6  ;;  %v2903_v47 = vpop.f32.mrf.mxu1 }
 0x228   :  { %v3123_v31 = vadd.f32 %v3122_v28, %v3047_v3 }
 0x229   :  { %v3051_v42 = vmul.f32 %v4776_v41, %v2965_v23  ;;  %v2968_v25 = vmax.f32 %v2902_v20, 0.0  ;;  %v2904_v49 = vadd.f32 %v2903_v47, %v2791_v36  ;;  %v3127_v45 = vadd.f32 %v5109_v4, %v3050_v5 }
 0x22a   :  { %3124 = vadd.xlane.f32.xlu1 %v3123_v31 }
 0x22b   :  { %v3054_v55 = vmul.f32 %v4771_v39, %v2968_v25  ;;  %v2969_v15 = vmax.f32 %v2904_v49, 0.0  ;;  %v3128_v60 = vadd.f32 %v3127_v45, %v3051_v42 }
 0x22d   :  { %v3055_v48 = vmul.f32 %v4776_v41, %v2969_v15  ;;  %3129 = vadd.xlane.f32.xlu0 %v3128_v60  ;;  %v3132_v43 = vadd.f32 %v5110_v27, %v3054_v55 }
 0x22f   :  { %v3133_v44 = vadd.f32 %v3132_v43, %v3055_v48 }
 0x231   :  { %3134 = vadd.xlane.f32.xlu1 %v3133_v44 }
 0x27f   :  { %v3060_v12 = vpop.xlane.xlu0 %3059 }
 0x280   :  { %v3138_v14 = vadd.f32 %v4910_v62, %v3060_v12 }
 0x282   :  { %v3154_v0 = vsub.f32 0.0, %v3138_v14 }
 0x283   :  { %v3065_v56 = vpop.xlane.xlu0 %3064 }
 0x284   :  { %v3170_v39 = vmul.f32 1.442695, %v3154_v0  ;;  %v3139_v50 = vadd.f32 %v4910_v62, %v3065_v56 }
 0x286   :  { %3968 = vpow2.f32 %v3170_v39  ;;  %v3155_v41 = vsub.f32 0.0, %v3139_v50 }
 0x287   :  { %v3070_v33 = vpop.xlane.xlu1 %3069 }
 0x288   :  { %v3172_v19 = vmul.f32 1.442695, %v3155_v41  ;;  %v3140_v22 = vadd.f32 %v4910_v62, %v3070_v33 }
 0x28a   :  { %3970 = vpow2.f32 %v3172_v19  ;;  %v3156_v32 = vsub.f32 0.0, %v3140_v22 }
 0x28b   :  { %v3075_v8 = vpop.xlane.xlu1 %3074 }
 0x28c   :  { %v3174_v52 = vmul.f32 1.442695, %v3156_v32  ;;  %v3141_v53 = vadd.f32 %v4910_v62, %v3075_v8 }
 0x28e   :  { %3972 = vpow2.f32 %v3174_v52  ;;  %v3157_v38 = vsub.f32 0.0, %v3141_v53 }
 0x28f   :  { %v3080_v61 = vpop.xlane.xlu0 %3079 }
 0x290   :  { %v3176_v34 = vmul.f32 1.442695, %v3157_v38  ;;  %v3142_v17 = vadd.f32 %v4910_v62, %v3080_v61 }
 0x292   :  { %3974 = vpow2.f32 %v3176_v34  ;;  %v3158_v30 = vsub.f32 0.0, %v3142_v17 }
 0x293   :  { %v3969_v9 = vpop.eup %3968  ;;  %v3085_v26 = vpop.xlane.xlu1 %3084 }
 0x294   :  { %v3202_v35 = vadd.f32 1.0, %v3969_v9  ;;  %v3178_v54 = vmul.f32 1.442695, %v3158_v30  ;;  %v3143_v2 = vadd.f32 %v4910_v62, %v3085_v26 }
 0x296   :  { %3976 = vrcp.f32 %v3202_v35  ;;  %v3159_v57 = vsub.f32 0.0, %v3143_v2 }
 0x297   :  { %v3971_v29 = vpop.eup %3970  ;;  %3978 = vpow2.f32 %v3178_v54  ;;  %v3090_v1 = vpop.xlane.xlu0 %3089 }
 0x298   :  { %v3203_v51 = vadd.f32 1.0, %v3971_v29  ;;  %v3180_v18 = vmul.f32 1.442695, %v3159_v57  ;;  %v3144_v16 = vadd.f32 %v4910_v62, %v3090_v1 }
 0x29a   :  { %3980 = vrcp.f32 %v3203_v51  ;;  %v3160_v24 = vsub.f32 0.0, %v3144_v16 }
 0x29b   :  { %v3973_v10 = vpop.eup %3972  ;;  %3982 = vpow2.f32 %v3180_v18  ;;  %v3095_v21 = vpop.xlane.xlu1 %3094 }
 0x29c   :  { %v3204_v40 = vadd.f32 1.0, %v3973_v10  ;;  %v3182_v6 = vmul.f32 1.442695, %v3160_v24  ;;  %v3145_v59 = vadd.f32 %v4910_v62, %v3095_v21 }
 0x29e   :  { %3984 = vrcp.f32 %v3204_v40  ;;  %v3161_v37 = vsub.f32 0.0, %v3145_v59 }
 0x29f   :  { %v3975_v7 = vpop.eup %3974  ;;  %3986 = vpow2.f32 %v3182_v6  ;;  %v3100_v3 = vpop.xlane.xlu0 %3099 }
 0x2a0   :  { %v3205_v58 = vadd.f32 1.0, %v3975_v7  ;;  %v3184_v11 = vmul.f32 1.442695, %v3161_v37  ;;  %v3146_v13 = vadd.f32 %v4910_v62, %v3100_v3 }
 0x2a2   :  { %3988 = vrcp.f32 %v3205_v58  ;;  %v3162_v63 = vsub.f32 0.0, %v3146_v13 }
 0x2a3   :  { %v3977_v46 = vpop.eup %3976  ;;  %3990 = vpow2.f32 %v3184_v11  ;;  %v3105_v28 = vpop.xlane.xlu1 %3104 }
 0x2a4   :  { %v3979_v5 = vpop.eup %3978  ;;  %3235 = vst.msk [vmem:[%s4997_s5] sm:$0xff] %vm3234_vm0, %v3977_v46  ;;  %v3186_v23 = vmul.f32 1.442695, %v3162_v63  ;;  %v3147_v20 = vadd.f32 %v4910_v62, %v3105_v28 }
 0x2a5   :  { %v3206_v36 = vadd.f32 1.0, %v3979_v5 }
 0x2a6   :  { %3992 = vpow2.f32 %v3186_v23  ;;  %v3163_v47 = vsub.f32 0.0, %v3147_v20 }
 0x2a7   :  { %v3981_v31 = vpop.eup %3980  ;;  %3994 = vrcp.f32 %v3206_v36  ;;  %v3110_v42 = vpop.xlane.xlu0 %3109 }
 0x2a8   :  { %v3983_v25 = vpop.eup %3982  ;;  %3236 = vst.msk [vmem:[%s4997_s5 + $0x8] sm:$0xff] %vm3234_vm0, %v3981_v31  ;;  %v3188_v49 = vmul.f32 1.442695, %v3163_v47  ;;  %v3148_v4 = vadd.f32 %v4910_v62, %v3110_v42 }
 0x2a9   :  { %v3207_v45 = vadd.f32 1.0, %v3983_v25 }
 0x2aa   :  { %3996 = vpow2.f32 %v3188_v49  ;;  %v3164_v55 = vsub.f32 0.0, %v3148_v4 }
 0x2ab   :  { %v3985_v15 = vpop.eup %3984  ;;  %3998 = vrcp.f32 %v3207_v45  ;;  %v3115_v60 = vpop.xlane.xlu1 %3114 }
 0x2ac   :  { %v3987_v48 = vpop.eup %3986  ;;  %3237 = vst.msk [vmem:[%s4997_s5 + $0x10] sm:$0xff] %vm3234_vm0, %v3985_v15  ;;  %v3190_v27 = vmul.f32 1.442695, %v3164_v55  ;;  %v3149_v43 = vadd.f32 %v4910_v62, %v3115_v60 }
 0x2ad   :  { %v3208_v44 = vadd.f32 1.0, %v3987_v48 }
 0x2ae   :  { %4000 = vpow2.f32 %v3190_v27  ;;  %v3165_v12 = vsub.f32 0.0, %v3149_v43 }
 0x2af   :  { %v3989_v14 = vpop.eup %3988  ;;  %4002 = vrcp.f32 %v3208_v44  ;;  %v3120_v0 = vpop.xlane.xlu0 %3119 }
 0x2b0   :  { %v3991_v56 = vpop.eup %3990  ;;  %3238 = vst.msk [vmem:[%s4997_s5 + $0x18] sm:$0xff] %vm3234_vm0, %v3989_v14  ;;  %v3192_v39 = vmul.f32 1.442695, %v3165_v12  ;;  %v3150_v50 = vadd.f32 %v4910_v62, %v3120_v0 }
 0x2b1   :  { %v3209_v41 = vadd.f32 1.0, %v3991_v56 }
 0x2b2   :  { %4004 = vpow2.f32 %v3192_v39  ;;  %v3166_v33 = vsub.f32 0.0, %v3150_v50 }
 0x2b3   :  { %v3993_v19 = vpop.eup %3992  ;;  %4006 = vrcp.f32 %v3209_v41  ;;  %v3125_v22 = vpop.xlane.xlu1 %3124 }
 0x2b4   :  { %v3995_v32 = vpop.eup %3994  ;;  %v3210_v8 = vadd.f32 1.0, %v3993_v19  ;;  %v3194_v52 = vmul.f32 1.442695, %v3166_v33  ;;  %v3151_v53 = vadd.f32 %v4910_v62, %v3125_v22 }
 0x2b5   :  { %3239 = vst.msk [vmem:[%s4997_s5 + $0x20] sm:$0xff] %vm3234_vm0, %v3995_v32 }
 0x2b6   :  { %4008 = vrcp.f32 %v3210_v8  ;;  %v3167_v38 = vsub.f32 0.0, %v3151_v53  ;;  %v3130_v61 = vpop.xlane.xlu0 %3129 }
 0x2b7   :  { %v3997_v34 = vpop.eup %3996  ;;  %4010 = vpow2.f32 %v3194_v52  ;;  %v3152_v17 = vadd.f32 %v4910_v62, %v3130_v61 }
 0x2b8   :  { %v3999_v30 = vpop.eup %3998  ;;  %v3211_v9 = vadd.f32 1.0, %v3997_v34  ;;  %v3196_v26 = vmul.f32 1.442695, %v3167_v38 }
 0x2b9   :  { %3240 = vst.msk [vmem:[%s4997_s5 + $0x28] sm:$0xff] %vm3234_vm0, %v3999_v30  ;;  %v3168_v35 = vsub.f32 0.0, %v3152_v17 }
 0x2ba   :  { %4012 = vrcp.f32 %v3211_v9  ;;  %v3135_v54 = vpop.xlane.xlu1 %3134 }
 0x2bb   :  { %v4001_v2 = vpop.eup %4000  ;;  %4014 = vpow2.f32 %v3196_v26  ;;  %v3198_v57 = vmul.f32 1.442695, %v3168_v35  ;;  %v3153_v29 = vadd.f32 %v4910_v62, %v3135_v54 }
 0x2bc   :  { %v4003_v1 = vpop.eup %4002  ;;  %v3212_v51 = vadd.f32 1.0, %v4001_v2 }
 0x2bd   :  { %3241 = vst.msk [vmem:[%s4997_s5 + $0x30] sm:$0xff] %vm3234_vm0, %v4003_v1  ;;  %4016 = vpow2.f32 %v3198_v57  ;;  %v3169_v18 = vsub.f32 0.0, %v3153_v29 }
 0x2be   :  { %4018 = vrcp.f32 %v3212_v51 }
 0x2bf   :  { %v4005_v16 = vpop.eup %4004  ;;  %v3200_v24 = vmul.f32 1.442695, %v3169_v18 }
 0x2c0   :  { %v4007_v10 = vpop.eup %4006  ;;  %v3213_v21 = vadd.f32 1.0, %v4005_v16 }
 0x2c1   :  { %3242 = vst.msk [vmem:[%s4997_s5 + $0x38] sm:$0xff] %vm3234_vm0, %v4007_v10  ;;  %4020 = vpow2.f32 %v3200_v24 }
 0x2c2   :  { %4022 = vrcp.f32 %v3213_v21 }
 0x2c3   :  { %v4009_v62 = vpop.eup %4008 }
 0x2c4   :  { %v4011_v40 = vpop.eup %4010  ;;  %3243 = vst.msk [vmem:[%s4997_s5 + $0x40] sm:$0xff] %vm3234_vm0, %v4009_v62 }
 0x2c5   :  { %v3214_v6 = vadd.f32 1.0, %v4011_v40 }
 0x2c7   :  { %v4013_v59 = vpop.eup %4012  ;;  %4024 = vrcp.f32 %v3214_v6 }
 0x2c8   :  { %v4015_v37 = vpop.eup %4014  ;;  %3244 = vst.msk [vmem:[%s4997_s5 + $0x48] sm:$0xff] %vm3234_vm0, %v4013_v59 }
 0x2c9   :  { %v3215_v7 = vadd.f32 1.0, %v4015_v37 }
 0x2ca   :  { %v4017_v3 = vpop.eup %4016 }
 0x2cb   :  { %v4019_v58 = vpop.eup %4018  ;;  %4026 = vrcp.f32 %v3215_v7  ;;  %v3216_v11 = vadd.f32 1.0, %v4017_v3 }
 0x2cc   :  { %3245 = vst.msk [vmem:[%s4997_s5 + $0x50] sm:$0xff] %vm3234_vm0, %v4019_v58 }
 0x2cd   :  { %4028 = vrcp.f32 %v3216_v11 }
 0x2ce   :  { %v4021_v13 = vpop.eup %4020 }
 0x2cf   :  { %v4023_v63 = vpop.eup %4022  ;;  %v3217_v46 = vadd.f32 1.0, %v4021_v13 }
 0x2d0   :  { %3246 = vst.msk [vmem:[%s4997_s5 + $0x58] sm:$0xff] %vm3234_vm0, %v4023_v63 }
 0x2d1   :  { %4030 = vrcp.f32 %v3217_v46 }
 0x2d4   :  { %v4025_v28 = vpop.eup %4024 }
 0x2d5   :  { %3247 = vst.msk [vmem:[%s4997_s5 + $0x60] sm:$0xff] %vm3234_vm0, %v4025_v28 }
 0x2d8   :  { %v4027_v5 = vpop.eup %4026 }
 0x2d9   :  { %3248 = vst.msk [vmem:[%s4997_s5 + $0x68] sm:$0xff] %vm3234_vm0, %v4027_v5 }
 0x2da   :  { %v4029_v23 = vpop.eup %4028 }
 0x2db   :  { %3249 = vst.msk [vmem:[%s4997_s5 + $0x70] sm:$0xff] %vm3234_vm0, %v4029_v23 }
 0x2de   :  { %v4031_v20 = vpop.eup %4030 }
 0x2df   :  { %3250 = vst.msk [vmem:[%s4997_s5 + $0x78] sm:$0xff] %vm3234_vm0, %v4031_v20 }
 0x2e0   :  { %3255 = vsyncpa [#allocation4], 1 }
 0x2e1   :  { %3256 = vsyncpa [#allocation6], 1 }

</bundles_post_ra>
